<compile_context>
chip_gen: v6e
topology: v6e:2x2x1
jax: 0.10.0
libtpu: 0.0.40
codegen_flags: <defaults>
</compile_context>

<pallas_src>
import jax
import jax.numpy as jnp
from jax.experimental import pallas as pl
from jax.experimental.pallas import tpu as pltpu


# ----------------------------------------------------------------------------- params
def _linear_init(key, fan_in, fan_out):
    kw, kb = jax.random.split(key)
    bound = 1.0 / float(fan_in) ** 0.5
    w = jax.random.uniform(kw, (fan_in, fan_out), jnp.float32, -bound, bound)
    b = jax.random.uniform(kb, (fan_out,), jnp.float32, -bound, bound)
    return w, b


def make_params(hidden_dim, key):
    h3, h4 = 3 * hidden_dim, 4 * hidden_dim
    k = jax.random.split(key, 6)
    w1, b1 = _linear_init(k[0], h3, h4)
    w2, b2 = _linear_init(k[1], h4, h4)
    w3, b3 = _linear_init(k[2], h4, 1)
    aw, ab = _linear_init(k[3], 1, 1)                      # AffineLinear (scalar)
    emb_w = 0.1 * jax.random.normal(k[4], (hidden_dim,), jnp.float32)
    emb_b = 0.1 * jax.random.normal(k[5], (hidden_dim,), jnp.float32)
    return dict(w1=w1, b1=b1, w2=w2, b2=b2, w3=w3, b3=b3,
                affine_w=aw.reshape(()), affine_b=ab.reshape(()),
                emb_w=emb_w, emb_b=emb_b)


# -------------------------------------------------------------------- feature extractor
def feature_extractor(x, params):
    # TODO(synk): stand-in for SiCL `Model` (graph_prediction=False, layers=8).
    # Elementwise, so XLA fuses it with the max-over-dataset reduction in the wrapper
    # and the (B, D, N, H) tensor never needs to round-trip HBM into the kernel.
    return jnp.tanh(x[..., None] * params["emb_w"] + params["emb_b"])


# ------------------------------------------------------------ VMEM budget / chunk picking
def _vmem_budget_bytes():
    try:
        cap = pltpu.get_tpu_info().vmem_capacity_bytes
    except Exception:
        cap = 64 * 1024 * 1024          # conservative: v7x per-TensorCore VMEM
    return int(cap * 0.75)              # leave headroom for Mosaic internal scratch


def _pick_t_chunk(N, H, mm_bytes, budget):
    """Largest divisor of N such that the per-chunk h1/h2 working set fits the budget."""
    H4, NN = 4 * H, N * N
    fixed = (NN + N) * H4 * 4                                           # bc + a scratch (f32)
    fixed += 2 * (H * 3 * H4 * 4 + H4 * H4 * mm_bytes + 3 * H4 * 4 + N * H * 4)
    per_t = NN * H4 * (4 + mm_bytes + 4) + 2 * NN * 4                   # h1(f32)+h1(mm)+h2(f32)+out
    tc = max(1, min(N, int(max(budget - fixed, per_t) // per_t)))
    while N % tc:
        tc -= 1
    return tc


# ------------------------------------------------------------- orientation model (Pallas)
def orientation_forward(node_feature, params, matmul_dtype=jnp.bfloat16):
    B, D, N, H = node_feature.shape
    H4, NN = 4 * H, N * N

    # Dataset-dim max done by XLA (fuses with the extractor); kernel sees (B, N, H) only.
    f = jnp.max(node_feature, axis=1)                                        # (B, N, H)

    # W1 (3H, 4H) split into its T/X/Y blocks and re-concatenated along the output dim
    # -> one (H, 3*4H) matmul produces all three projections in a single MXU push.
    w1 = params["w1"]
    w1cat = jnp.concatenate([w1[:H], w1[H:2 * H], w1[2 * H:]], axis=1)       # (H, 3*H4)
    b1 = params["b1"].reshape(1, H4)
    b2 = params["b2"].reshape(1, H4)
    # Fold the final scalar affine into the last linear layer:
    #   sigmoid(aw*(h2@w3 + b3) + ab) == sigmoid(h2 . (aw*w3) + (aw*b3 + ab))
    w3row = (params["w3"][:, 0] * params["affine_w"]).reshape(1, H4)         # (1, H4)
    b3f = (params["affine_w"] * params["b3"][0] + params["affine_b"]).reshape(1, 1)
    w2 = params["w2"].astype(matmul_dtype)                                   # dominant matmul operand

    mm_bytes = jnp.dtype(matmul_dtype).itemsize
    budget = _vmem_budget_bytes()
    TC = _pick_t_chunk(N, H, mm_bytes, budget)                               # rows of outer node dim
    T = N // TC

    def fused_kernel(f_ref, w1_ref, b1_ref, w2_ref, b2_ref, w3_ref, b3_ref,
                     out_ref, a_sc, bc_sc):
        t = pl.program_id(1)

        # Per-batch prologue: first-layer projections + (N*N, 4H) B+C table, computed
        # once per batch and reused by every T chunk (scratch persists across the grid).
        @pl.when(t == 0)
        def _():
            fb = f_ref[0]                                                     # (N, H)
            proj = jnp.dot(fb, w1_ref[...],
                           preferred_element_type=jnp.float32)               # (N, 3*H4)
            a_sc[...] = proj[:, :H4] + b1_ref[...]                            # (N, H4)
            bx = proj[:, H4:2 * H4]
            cy = proj[:, 2 * H4:]
            bc_sc[...] = (bx[:, None, :] + cy[None, :, :]).reshape(NN, H4)    # (N*N, H4)

        # h1[t, x, y] = relu(A[t] + Bx[x] + Cy[y]) for the TC outer rows of this chunk.
        row0 = pl.multiple_of(t * TC, TC)
        a_t = a_sc[pl.ds(row0, TC), :]                                        # (TC, H4)
        h1 = jnp.maximum(a_t[:, None, :] + bc_sc[...][None, :, :], 0.0)       # (TC, NN, H4)
        h1 = h1.reshape(TC * NN, H4).astype(matmul_dtype)
        # Second layer: tall-skinny MXU matmul, f32 accumulation.
        h2 = jnp.maximum(
            jnp.dot(h1, w2_ref[...], preferred_element_type=jnp.float32) + b2_ref[...],
            0.0)                                                              # (TC*NN, H4)
        # Final (4H -> 1) layer + scalar affine as a VPU multiply + lane reduction.
        logits = jnp.sum(h2.reshape(TC, NN, H4) * w3_ref[...], axis=-1) + b3_ref[0, 0]
        out_ref[0] = jax.nn.sigmoid(logits)                                   # (TC, NN)

    flops = (2 * B * (N ** 3) * H4 * H4          # h1 @ w2
             + 2 * B * N * H * 3 * H4            # f @ w1cat
             + 2 * B * (N ** 3) * H4)            # final reduce
    bytes_accessed = 4 * (B * N * H + H * 3 * H4 + 3 * H4 + 1 + B * N ** 3) \
        + mm_bytes * H4 * H4
    cost = pl.CostEstimate(flops=flops, transcendentals=B * N ** 3,
                           bytes_accessed=bytes_accessed)

    out3 = pl.pallas_call(
        fused_kernel,
        grid=(B, T),
        in_specs=[
            pl.BlockSpec((1, N, H), lambda b, t: (b, 0, 0)),    # constant over t -> no re-DMA
            pl.BlockSpec((H, 3 * H4), lambda b, t: (0, 0)),
            pl.BlockSpec((1, H4), lambda b, t: (0, 0)),
            pl.BlockSpec((H4, H4), lambda b, t: (0, 0)),
            pl.BlockSpec((1, H4), lambda b, t: (0, 0)),
            pl.BlockSpec((1, H4), lambda b, t: (0, 0)),
            pl.BlockSpec(memory_space=pltpu.MemorySpace.SMEM),  # folded b3 scalar
        ],
        out_specs=pl.BlockSpec((1, TC, NN), lambda b, t: (b, t, 0)),
        out_shape=jax.ShapeDtypeStruct((B, N, NN), jnp.float32),
        scratch_shapes=[
            pltpu.VMEM((N, H4), jnp.float32),    # a  : T projection + b1
            pltpu.VMEM((NN, H4), jnp.float32),   # bc : X + Y projection table
        ],
        compiler_params=pltpu.CompilerParams(
            dimension_semantics=("parallel", "arbitrary"),
            vmem_limit_bytes=budget),
        cost_estimate=cost,
    )(f, w1cat, b1, w2, b2, w3row, b3f)

    cube = out3.reshape(B, N, N, N)
    return jnp.squeeze(cube)          # mirrors torch .squeeze()


def whole_nodewise_model(x, params, matmul_dtype=jnp.bfloat16):
    node_feature = feature_extractor(x, params)          # freeze=True -> same values
    return {"vstruc": orientation_forward(node_feature, params, matmul_dtype)}


# ------------------------------------------------------------------ pure-JAX reference
def orientation_reference(node_feature, params):
    f = jnp.max(node_feature, axis=-3)                   # (B, N, H)
    B, N, H = f.shape
    ft = jnp.broadcast_to(f[:, :, None, None, :], (B, N, N, N, H))
    fx = jnp.broadcast_to(f[:, None, :, None, :], (B, N, N, N, H))
    fy = jnp.broadcast_to(f[:, None, None, :, :], (B, N, N, N, H))
    cat = jnp.concatenate([ft, fx, fy], axis=-1)
    h1 = jax.nn.relu(cat @ params["w1"] + params["b1"])
    h2 = jax.nn.relu(h1 @ params["w2"] + params["b2"])
    h3 = h2 @ params["w3"] + params["b3"]
    out = jax.nn.sigmoid(params["affine_w"] * h3 + params["affine_b"])
    return jnp.squeeze(out)


# -------------------------------------------------------------------------------- main
if __name__ == "__main__":
    B, D, N, H = 2, 16, 8, 32                            # small shapes; hidden_dim=32
    key = jax.random.PRNGKey(0)
    kx, kp = jax.random.split(key)
    x = jax.random.normal(kx, (B, D, N), jnp.float32)
    params = make_params(H, kp)

    ref = orientation_reference(feature_extractor(x, params), params)

    # Exact-parity path (f32 matmul operands).
    out_f32 = jax.block_until_ready(
        whole_nodewise_model(x, params, matmul_dtype=jnp.float32)["vstruc"])
    assert out_f32.shape == (B, N, N, N), out_f32.shape
    assert jnp.allclose(out_f32, ref, atol=1e-5, rtol=1e-5), "f32 mismatch vs reference"

    # Fast path: bf16 operands on the dominant (N^3,4H)x(4H,4H) matmul, f32 accumulation.
    out_bf16 = jax.block_until_ready(
        whole_nodewise_model(x, params, matmul_dtype=jnp.bfloat16)["vstruc"])
    assert out_bf16.shape == (B, N, N, N), out_bf16.shape
    assert jnp.allclose(out_bf16, ref, atol=1e-2), "bf16 mismatch vs reference"

    print("KERNEL_OK")
</pallas_src>

<mosaic_0001>
module attributes {stable_mosaic.version = 11 : i64} {
  func.func @fused_kernel(%arg0: i32, %arg1: i32, %arg2: memref<1x8x32xf32, #tpu.memory_space<vmem>>, %arg3: memref<32x384xf32, #tpu.memory_space<vmem>>, %arg4: memref<1x128xf32, #tpu.memory_space<vmem>>, %arg5: memref<128x128xf32, #tpu.memory_space<vmem>>, %arg6: memref<1x128xf32, #tpu.memory_space<vmem>>, %arg7: memref<1x128xf32, #tpu.memory_space<vmem>>, %arg8: memref<1x1xf32, #tpu.memory_space<smem>>, %arg9: memref<1x8x64xf32, #tpu.memory_space<vmem>>, %arg10: memref<8x128xf32, #tpu.memory_space<vmem>>, %arg11: memref<64x128xf32, #tpu.memory_space<vmem>>) attributes {dimension_semantics = [#tpu.dimension_semantics<parallel>, #tpu.dimension_semantics<arbitrary>], iteration_bounds = array<i64: 2, 1>, scalar_prefetch = 0 : i64, scratch_operands = 2 : i64, tpu.core_type = #tpu.core_type<tc>, window_params = [{transform_indices = @transform_0, window_bounds = array<i64: 1, 8, 32>}, {pipeline_mode = #tpu.pipeline_mode<synchronous>, transform_indices = @transform_1, window_bounds = array<i64: 32, 384>}, {pipeline_mode = #tpu.pipeline_mode<synchronous>, transform_indices = @transform_2, window_bounds = array<i64: 1, 128>}, {pipeline_mode = #tpu.pipeline_mode<synchronous>, transform_indices = @transform_3, window_bounds = array<i64: 128, 128>}, {pipeline_mode = #tpu.pipeline_mode<synchronous>, transform_indices = @transform_4, window_bounds = array<i64: 1, 128>}, {pipeline_mode = #tpu.pipeline_mode<synchronous>, transform_indices = @transform_5, window_bounds = array<i64: 1, 128>}, {transform_indices = @transform_6, window_bounds = array<i64: 1, 1>}, {transform_indices = @transform_7, window_bounds = array<i64: 1, 8, 64>}]} {
    %c0_i32 = arith.constant 0 : i32
    %0 = arith.cmpi eq, %arg1, %c0_i32 : i32
    %1 = arith.extui %0 : i1 to i32
    %c0_i32_0 = arith.constant 0 : i32
    %2 = arith.cmpi ne, %1, %c0_i32_0 : i32
    scf.if %2 {
      %c0_18 = arith.constant 0 : index
      %c0_19 = arith.constant 0 : index
      %c0_20 = arith.constant 0 : index
      %40 = vector.load %arg2[%c0_18, %c0_19, %c0_20] : memref<1x8x32xf32, #tpu.memory_space<vmem>>, vector<1x8x32xf32>
      %41 = vector.shape_cast %40 : vector<1x8x32xf32> to vector<8x32xf32>
      %c0_21 = arith.constant 0 : index
      %c0_22 = arith.constant 0 : index
      %42 = vector.load %arg3[%c0_21, %c0_22] : memref<32x384xf32, #tpu.memory_space<vmem>>, vector<32x384xf32>
      %cst_23 = arith.constant dense<0.000000e+00> : vector<8x384xf32>
      %43 = tpu.matmul %41, %42, %cst_23 {dimension_numbers = #tpu.dot_dimension_numbers<[1], [0], [0], [1], [0, 0, 1, 1], [], []>} : vector<8x32xf32>, vector<32x384xf32>, vector<8x384xf32> -> vector<8x384xf32>
      %44 = vector.extract_strided_slice %43 {offsets = [0, 0], sizes = [8, 128], strides = [1, 1]} : vector<8x384xf32> to vector<8x128xf32>
      %c0_24 = arith.constant 0 : index
      %c0_25 = arith.constant 0 : index
      %45 = vector.load %arg4[%c0_24, %c0_25] : memref<1x128xf32, #tpu.memory_space<vmem>>, vector<1x128xf32>
      %46 = vector.broadcast %45 : vector<1x128xf32> to vector<8x128xf32>
      %47 = arith.addf %44, %46 : vector<8x128xf32>
      %c0_26 = arith.constant 0 : index
      %c0_27 = arith.constant 0 : index
      %48 = vector.load %arg10[%c0_26, %c0_27] : memref<8x128xf32, #tpu.memory_space<vmem>>, vector<8x128xf32>
      tpu.vector_store %arg10[%c0_26, %c0_27], %47 {strides = array<i32>} : memref<8x128xf32, #tpu.memory_space<vmem>>, vector<8x128xf32>,
      %49 = vector.extract_strided_slice %43 {offsets = [0, 128], sizes = [8, 128], strides = [1, 1]} : vector<8x384xf32> to vector<8x128xf32>
      %50 = vector.extract_strided_slice %43 {offsets = [0, 256], sizes = [8, 128], strides = [1, 1]} : vector<8x384xf32> to vector<8x128xf32>
      %51 = vector.shape_cast %49 : vector<8x128xf32> to vector<8x1x128xf32>
      %52 = vector.shape_cast %50 : vector<8x128xf32> to vector<1x8x128xf32>
      %53 = vector.broadcast %51 : vector<8x1x128xf32> to vector<8x8x128xf32>
      %54 = vector.broadcast %52 : vector<1x8x128xf32> to vector<8x8x128xf32>
      %55 = arith.addf %53, %54 : vector<8x8x128xf32>
      %56 = vector.shape_cast %55 : vector<8x8x128xf32> to vector<64x128xf32>
      %c0_28 = arith.constant 0 : index
      %c0_29 = arith.constant 0 : index
      %57 = vector.load %arg11[%c0_28, %c0_29] : memref<64x128xf32, #tpu.memory_space<vmem>>, vector<64x128xf32>
      tpu.vector_store %arg11[%c0_28, %c0_29], %56 {strides = array<i32>} : memref<64x128xf32, #tpu.memory_space<vmem>>, vector<64x128xf32>,
    } else {
    }
    %c8_i32 = arith.constant 8 : i32
    %3 = arith.muli %arg1, %c8_i32 : i32
    %4 = tpu.assume_multiple %3, 8 : i32
    %5 = arith.index_cast %4 : i32 to index
    %c0 = arith.constant 0 : index
    %6 = vector.load %arg10[%5, %c0] : memref<8x128xf32, #tpu.memory_space<vmem>>, vector<8x128xf32>
    %7 = vector.shape_cast %6 : vector<8x128xf32> to vector<8x1x128xf32>
    %c0_1 = arith.constant 0 : index
    %c0_2 = arith.constant 0 : index
    %8 = vector.load %arg11[%c0_1, %c0_2] : memref<64x128xf32, #tpu.memory_space<vmem>>, vector<64x128xf32>
    %9 = vector.shape_cast %8 : vector<64x128xf32> to vector<1x64x128xf32>
    %10 = vector.broadcast %7 : vector<8x1x128xf32> to vector<8x64x128xf32>
    %11 = vector.broadcast %9 : vector<1x64x128xf32> to vector<8x64x128xf32>
    %12 = arith.addf %10, %11 : vector<8x64x128xf32>
    %cst = arith.constant 0.000000e+00 : f32
    %13 = vector.broadcast %cst : f32 to vector<8x64x128xf32>
    %14 = arith.maximumf %12, %13 : vector<8x64x128xf32>
    %15 = vector.shape_cast %14 : vector<8x64x128xf32> to vector<512x128xf32>
    %c0_3 = arith.constant 0 : index
    %c0_4 = arith.constant 0 : index
    %16 = vector.load %arg5[%c0_3, %c0_4] : memref<128x128xf32, #tpu.memory_space<vmem>>, vector<128x128xf32>
    %cst_5 = arith.constant dense<0.000000e+00> : vector<512x128xf32>
    %17 = tpu.matmul %15, %16, %cst_5 {dimension_numbers = #tpu.dot_dimension_numbers<[1], [0], [0], [1], [0, 0, 1, 1], [], []>} : vector<512x128xf32>, vector<128x128xf32>, vector<512x128xf32> -> vector<512x128xf32>
    %c0_6 = arith.constant 0 : index
    %c0_7 = arith.constant 0 : index
    %18 = vector.load %arg6[%c0_6, %c0_7] : memref<1x128xf32, #tpu.memory_space<vmem>>, vector<1x128xf32>
    %19 = vector.broadcast %18 : vector<1x128xf32> to vector<512x128xf32>
    %20 = arith.addf %17, %19 : vector<512x128xf32>
    %cst_8 = arith.constant 0.000000e+00 : f32
    %21 = vector.broadcast %cst_8 : f32 to vector<512x128xf32>
    %22 = arith.maximumf %20, %21 : vector<512x128xf32>
    %23 = vector.shape_cast %22 : vector<512x128xf32> to vector<8x64x128xf32>
    %c0_9 = arith.constant 0 : index
    %c0_10 = arith.constant 0 : index
    %24 = vector.load %arg7[%c0_9, %c0_10] : memref<1x128xf32, #tpu.memory_space<vmem>>, vector<1x128xf32>
    %25 = vector.shape_cast %24 : vector<1x128xf32> to vector<1x1x128xf32>
    %26 = vector.broadcast %25 : vector<1x1x128xf32> to vector<8x64x128xf32>
    %27 = arith.mulf %23, %26 : vector<8x64x128xf32>
    %cst_11 = arith.constant dense<0.000000e+00> : vector<8x64xf32>
    %28 = vector.multi_reduction <add>, %27, %cst_11 [2] : vector<8x64x128xf32> to vector<8x64xf32>
    %c0_12 = arith.constant 0 : index
    %c0_13 = arith.constant 0 : index
    %29 = memref.load %arg8[%c0_12, %c0_13] : memref<1x1xf32, #tpu.memory_space<smem>>
    %30 = vector.broadcast %29 : f32 to vector<8x64xf32>
    %31 = arith.addf %28, %30 : vector<8x64xf32>
    %32 = arith.negf %31 : vector<8x64xf32>
    %33 = math.exp %32 : vector<8x64xf32>
    %cst_14 = arith.constant 1.000000e+00 : f32
    %34 = vector.broadcast %cst_14 : f32 to vector<8x64xf32>
    %35 = arith.addf %34, %33 : vector<8x64xf32>
    %36 = arith.divf %34, %35 : vector<8x64xf32>
    %c0_15 = arith.constant 0 : index
    %c0_16 = arith.constant 0 : index
    %c0_17 = arith.constant 0 : index
    %37 = vector.load %arg9[%c0_15, %c0_16, %c0_17] : memref<1x8x64xf32, #tpu.memory_space<vmem>>, vector<1x8x64xf32>
    %38 = vector.shape_cast %37 : vector<1x8x64xf32> to vector<8x64xf32>
    %39 = vector.shape_cast %36 : vector<8x64xf32> to vector<1x8x64xf32>
    tpu.vector_store %arg9[%c0_15, %c0_16, %c0_17], %39 {strides = array<i32>} : memref<1x8x64xf32, #tpu.memory_space<vmem>>, vector<1x8x64xf32>,
    return
  }
  func.func @transform_0(%arg0: i32, %arg1: i32) -> (i32, i32, i32) {
    %c0_i32 = arith.constant 0 : i32
    %c0_i32_0 = arith.constant 0 : i32
    %c0_i32_1 = arith.constant 0 : i32
    return %arg0, %c0_i32, %c0_i32_0 : i32, i32, i32
  }
  func.func @transform_1(%arg0: i32, %arg1: i32) -> (i32, i32) {
    %c0_i32 = arith.constant 0 : i32
    %c0_i32_0 = arith.constant 0 : i32
    %c0_i32_1 = arith.constant 0 : i32
    return %c0_i32, %c0_i32_0 : i32, i32
  }
  func.func @transform_2(%arg0: i32, %arg1: i32) -> (i32, i32) {
    %c0_i32 = arith.constant 0 : i32
    %c0_i32_0 = arith.constant 0 : i32
    %c0_i32_1 = arith.constant 0 : i32
    return %c0_i32, %c0_i32_0 : i32, i32
  }
  func.func @transform_3(%arg0: i32, %arg1: i32) -> (i32, i32) {
    %c0_i32 = arith.constant 0 : i32
    %c0_i32_0 = arith.constant 0 : i32
    %c0_i32_1 = arith.constant 0 : i32
    return %c0_i32, %c0_i32_0 : i32, i32
  }
  func.func @transform_4(%arg0: i32, %arg1: i32) -> (i32, i32) {
    %c0_i32 = arith.constant 0 : i32
    %c0_i32_0 = arith.constant 0 : i32
    %c0_i32_1 = arith.constant 0 : i32
    return %c0_i32, %c0_i32_0 : i32, i32
  }
  func.func @transform_5(%arg0: i32, %arg1: i32) -> (i32, i32) {
    %c0_i32 = arith.constant 0 : i32
    %c0_i32_0 = arith.constant 0 : i32
    %c0_i32_1 = arith.constant 0 : i32
    return %c0_i32, %c0_i32_0 : i32, i32
  }
  func.func @transform_6(%arg0: i32, %arg1: i32) -> (i32, i32) {
    %c0_i32 = arith.constant 0 : i32
    %c0_i32_0 = arith.constant 0 : i32
    %c0_i32_1 = arith.constant 0 : i32
    return %c0_i32, %c0_i32_0 : i32, i32
  }
  func.func @transform_7(%arg0: i32, %arg1: i32) -> (i32, i32, i32) {
    %c0_i32 = arith.constant 0 : i32
    %c0_i32_0 = arith.constant 0 : i32
    return %arg0, %arg1, %c0_i32 : i32, i32, i32
  }
}

</mosaic_0001>

<bundles_post_ra>
// kernel: tpu_custom_call.1
= control target key start
LH: loop header
LB: loop body
LE: loop exit
PB: predicated region body
PF: predicated region fallthrough
CT: control target
= control target key end

     0   :  { %s4332_s0 = inlined_call_operand.hbm [shape: f32[2,8,32], index: 0, kind: input, shape index: {}]   ;;  %s4333_s1 = inlined_call_operand.hbm [shape: f32[32,384], index: 1, kind: input, shape index: {}]   ;;  %s4334_s2 = inlined_call_operand.vmem [shape: f32[1,128], index: 2, kind: input, shape index: {}]   ;;  %s4335_s3 = inlined_call_operand.hbm [shape: f32[128,128], index: 3, kind: input, shape index: {}]   ;;  %s4336_s4 = inlined_call_operand.vmem [shape: f32[1,128], index: 4, kind: input, shape index: {}]   ;;  %s4337_s5 = inlined_call_operand.vmem [shape: f32[1,128], index: 5, kind: input, shape index: {}]   ;;  %s4338_s6 = inlined_call_operand.<no memory space> [shape: f32[1,1], index: 6, kind: input, shape index: {}]   ;;  %s4339_s7 = inlined_call_operand.hbm [shape: f32[2,8,64], index: 7, kind: output, shape index: {}]  }
   0x1   :  { %4343 = sst [smem:[#allocation15_spill]] %s4333_s1 }
   0x2   :  { %4344 = sst [smem:[#allocation16_spill]] %s4335_s3 }
   0x3   :  { %12 = sst [smem:[#allocation4]] %s4338_s6 }
   0x4   :  { %13 = vsyncpa [#allocation6], 0 }
   0x5   :  { %15 = vsyncpa [#allocation6 + $0x1], 0 }
   0x6   :  { %16 = vsyncpa [#allocation9], 0 }
   0x7   :  { %17 = vsyncpa [#allocation7], 0 }
   0x8   :  { %19 = vsyncpa [#allocation7 + $0x1], 0  ;;  %s3397_s26 = smov 0   ;;  %s3399_s27 = smov 0  }
   0x9   :  { %s3401_s28 = smov 0   ;;  %s3403_s29 = smov 0  }
   0xa   :  { %s3405_s30 = smov 0   ;;  %s3407_s8 = smov 0  }
   0xb LB: > { %s2489_s6 = sadd.s32 4294967295, %s3341_s8   ;;  %s2490_s9 = sadd.s32 4294967294, %s3341_s8   ;;  %s3341_s8 = sphi %s3407_s8, %s25_s8   ;;  %s3337_s30 = sphi %s3405_s30, %s4363_s30   ;;  %s3333_s29 = sphi %s3403_s29, %s4362_s29   ;;  %s3329_s28 = sphi %s3401_s28, %s4361_s28   ;;  %s3325_s27 = sphi %s3399_s27, %s4360_s27   ;;  %s3321_s26 = sphi %s3397_s26, %s4359_s26  }
   0xc   : > { %p57_p0 = scmp.ne.s32.totalorder %s3325_s27, %s3321_s26  ;;  %p3431_p1 = scmp.eq.s32.totalorder %s2489_s6, 0 }
   0xd   : > { %p3435_p2 = scmp.eq.s32.totalorder %s2489_s6, 1  ;;  %p215_p3 = scmp.eq.s32.totalorder %s2490_s9, 1 }
   0xe   : > { %s4345_s10 = scalar_select %p3431_p1, 1, 0 }
   0xf   : > { %p3441_p4 = por %p3431_p1, %p57_p0  ;;  %p2491_p5 = scmp.ge.s32.totalorder %s3341_s8, 1 }
  0x10   : > { %p3446_p6 = por %p215_p3, %p57_p0  ;;  %p222_p7 = scmp.lt.s32.totalorder %s3341_s8, 3 }
  0x11   : > { %s4347_s12 = scalar_select %p3441_p4, 1, 0 }
  0x12   : > { %s4348_s13 = scalar_select %p3446_p6, 1, 0 }
  0x13   : > { %p3451_p8 = pnand %p2491_p5, %p222_p7  ;;  %s3343_s15 = smov [#allocation8]  }
  0x14   : > { %s234_s16 = sshll.u32 %s3343_s15, 4  ;;  %s3344_s18 = smov [#allocation10]   ;;  %s235_s16 = int_to_ptr.vmem [resolvable:$true] %s234_s16 }
  0x15   : > { %p2843_p9 = pneg %p3451_p8  ;;  %s250_s19 = sshll.u32 %s3344_s18, 4  ;;  %s251_s19 = int_to_ptr.vmem [resolvable:$true] %s250_s19 }
  0x16   : > { %s3188_s20 = scalar_lea.vmem %s235_s16, 1536  ;;  %p3196_p5 = scmp.lt.s32.totalorder %s235_s16, %s235_s16 }
  0x17   : > { %p3460_p11 = pnand %p2843_p9, %p3431_p1  ;;  %p3189_p13 = scmp.ne.s32.totalorder %s235_s16, %s3188_s20 }
  0x18   : > { %p3197_p7 = scmp.lt.s32.totalorder %s3188_s20, %s3188_s20 }
  0x19   : > { %p3179_p12 = pneg %p3460_p11 }
  0x1a   : > { %p3198_p10 = por %p3197_p7, %p3196_p5 }
  0x1b   : > { %p3191_p0 = pnand %p3189_p13, %p3179_p12 }
  0x1d   : > { %p3192_p3 = pneg %p3191_p0 }
  0x1f   : > { %p3199_p9 = pnand %p3198_p10, %p3192_p3 }
  0x21   : > { %3202 = shalt.err (!%p3199_p9)
}
  0x22   : > { %s3345_s21 = smov 384   ;;  %s3346_s22 = smov 24  }
  0x23   : > { %s4351_s1 = sld [smem:[#allocation15_spill]]  ;;  %s3214_s25 = scalar_lea.vmem %s251_s19, 2048 }
  0x24   : > { %p3215_p6 = scmp.ne.s32.totalorder %s251_s19, %s3214_s25  ;;  %p3222_p1 = scmp.lt.s32.totalorder %s251_s19, %s251_s19 }
  0x25   : > { %p3223_p4 = scmp.lt.s32.totalorder %s3214_s25, %s3214_s25 }
  0x26   : > { %p3217_p13 = pnand %p3215_p6, %p3179_p12 }
  0x27   : > { %p3224_p5 = por %p3223_p4, %p3222_p1 }
  0x28   : > { %p3218_p0 = pneg %p3217_p13 }
  0x29   : > { %2846 = dma.hbm_to_vmem [thread:$0]  (!%p3460_p11), %s4351_s1, 1536, %s235_s16, [#allocation9], %s3345_s21, %s3345_s21, %s3346_s22  }
  0x2a   : > { %p3225_p10 = pnand %p3224_p5, %p3218_p0 }
  0x2c   : > { %3228 = shalt.err (!%p3225_p10)
}
  0x2d   : > { %s3347_s6 = smov 128   ;;  %s3348_s9 = smov 8  }
  0x2e   : > { %s4352_s3 = sld [smem:[#allocation16_spill]]  ;;  %s37_s18 = sadd.s32 1, %s3337_s30 }
  0x2f   : > { %s44_s20 = sadd.s32 1, %s3329_s28  ;;  %p39_p1 = scmp.ge.s32.totalorder %s37_s18, 2 }
  0x30   : > { %p51_p4 = scmp.ne.s32.totalorder %s3329_s28, %s3325_s27  ;;  %p52_p6 = scmp.eq.s32.totalorder %s3341_s8, 0 }
  0x31   : > { %p2860_p12 = scmp.lt.s32.totalorder %s3341_s8, 2  ;;  %s4365_s18 = smov (%p39_p1, %s37_s18), 0 }
  0x32   : > { %p53_p3 = por %p52_p6, %p51_p4  ;;  %p3492_p7 = por %p3435_p2, %p51_p4 }
  0x33   : > { %s41_s17 = ssub.s32 %s3337_s30, %s4365_s18  ;;  %s273_s22 = sand.u32 1, %s3329_s28  }
  0x34   : > { %2849 = dma.hbm_to_vmem [thread:$0]  (!%p3460_p11), %s4352_s3, 2048, %s251_s19, [#allocation9], %s3347_s6, %s3347_s6, %s3348_s9  }
  0x35   : > { %p42_p9 = scmp.eq.s32.totalorder %s41_s17, 0  ;;  %s2495_s19 = sshll.u32 %s273_s22, 3 }
  0x36   : > { %s2496_s23 = sshll.u32 %s3337_s30, 7  ;;  %s277_s15 = scalar_lea.vmem [#allocation5], %s2495_s19 }
  0x37   : > { %s3501_s24 = scalar_select %p42_p9, %s3329_s28, %s44_s20  }
  0x38   : > { %s282_s9 = scalar_lea.hbm %s4332_s0, %s2496_s23  ;;  %s284_s16 = sshll.u32 %s277_s15, 4  ;;  %s285_s16 = int_to_ptr.vmem [resolvable:$true] %s284_s16 }
  0x39   : > { %p3508_p11 = pnand %p2860_p12, %p53_p3  ;;  %s274_s1 = scalar_lea.sflag [#allocation6], %s273_s22 }
  0x3a   : > { %s3242_s17 = scalar_lea.vmem %s285_s16, 128  ;;  %s3349_s20 = smov [#allocation5]  }
  0x3b   : > { %p3231_p2 = pneg %p3508_p11  ;;  %p3243_p13 = scmp.ne.s32.totalorder %s285_s16, %s3242_s17 }
  0x3c   : > { %s3247_s3 = sshll.u32 %s3349_s20, 4  ;;  %s3248_s3 = int_to_ptr.vmem [resolvable:$false] %s3247_s3 }
  0x3d   : > { %p3245_p0 = pnand %p3243_p13, %p3231_p2  ;;  %s3249_s23 = scalar_lea.vmem %s3248_s3, 256 }
  0x3e   : > { %p3250_p10 = scmp.lt.s32.totalorder %s285_s16, %s3248_s3  ;;  %p3251_p1 = scmp.lt.s32.totalorder %s3249_s23, %s3242_s17 }
  0x3f   : > { %p3246_p5 = pneg %p3245_p0 }
  0x40   : > { %p3252_p4 = por %p3251_p1, %p3250_p10 }
  0x42   : > { %p3253_p6 = pnand %p3252_p4, %p3246_p5 }
  0x44   : > { %3256 = shalt.err (!%p3253_p6)
}
  0x45   : > { %2853 = dma.hbm_to_vmem [thread:$0]  (!%p3508_p11), %s282_s9, 128, %s285_s16, %s274_s1  }
  0x46   : > { %293 = sbr.rel (%p3451_p8) target bundleno = 813 (0x32d), region = 48  ;;  %s3519_s22 = sand.u32 (!%p3451_p8), 1, %s3325_s27  }
  0x47   : > { %s2498_s19 = sshll.u32 (!%p3451_p8), %s3519_s22, 3  ;;  %s296_s25 = scalar_lea.sflag (!%p3451_p8), [#allocation6], %s3519_s22 }
  0x48   : > { %s299_s3 = scalar_lea.vmem (!%p3451_p8), [#allocation5], %s2498_s19  ;;  %p4355_p12 = scmp.ne.s32.totalorder (!%p3451_p8), %s4347_s12, 0 }
  0x4b   : > { %3308 = dma.done.wait (%p4355_p12), %s296_s25, 128  }
  0x4c   : > { %3310 = vsyncadd (%p4355_p12), %s296_s25, 4294967168  ;;  %p4356_p3 = scmp.ne.s32.totalorder %s4345_s10, 0 }
  0x4e   : > { %3312 = dma.done.wait (%p4356_p3), [#allocation9], 3584  }
  0x4f   : > { %3314 = vsyncadd (%p4356_p3), [#allocation9], 4294963712  ;;  %v3350_v0 = vmov 0.0   ;;  %vm3351_vm0 = vmmov 0   ;;  %v353_v1 = vld [vmem:[#allocation8 + $0x50] sm:$0xff]  ;;  %v352_v2 = vld [vmem:[#allocation8 + $0x48] sm:$0xff]  ;;  %v514_v32 = vlaneseq }
  0x50   : > { %423 = vmatprep.mubr.f32.mxu0 %v3350_v0  ;;  %2660 = vmatprep.subr.mxu1 %v3350_v0  ;;  %v350_v3 = vld [vmem:[#allocation8 + $0x38] sm:$0xff]  ;;  %v349_v4 = vld [vmem:[#allocation8 + $0x30] sm:$0xff]  ;;  %v347_v5 = vld [vmem:[#allocation8 + $0x20] sm:$0xff]  ;;  %vm355_vm1 = vcmask 261120   ;;  %v3352_v30 = vmov 1966171168  }
  0x51   : > { %2668 = vmatprep.mubr.msk.f32.mxu1 %vm3351_vm0, %v3350_v0  ;;  %383 = vmatprep.subr.mxu0 %v353_v1  ;;  %v346_v6 = vld [vmem:[#allocation8 + $0x18] sm:$0xff]  ;;  %v351_v8 = vld [vmem:[#allocation8 + $0x40] sm:$0xff]  ;;  %v344_v9 = vld [vmem:[#allocation8 + $0x8] sm:$0xff]  ;;  %v512_v31 = vunpack.c.l.s4 %v3352_v30  ;;  %v3534_v34 = vshrl.u32 %v514_v32, 7  ;;  %s1515_s15 = sld [smem:[#allocation4]]  ;;  %vm2040_vm2 = vcmask 130112  }
  0x52   : > { %384 = vmatpush1.msra.mxu0 %v352_v2  ;;  %v354_v7 = vld [vmem:[#allocation8 + $0x58] sm:$0xff]  ;;  %v343_v10 = vld [vmem:[#allocation8] sm:$0xff]  ;;  %v348_v11 = vld [vmem:[#allocation8 + $0x28] sm:$0xff]  ;;  %vm2047_vm3 = vcmask 195712   ;;  %vm2054_vm4 = vcmask 261312   ;;  %vm2061_vm5 = vcmask 326912  }
  0x53   : > { %385 = vmatprep.subr.mxu0 %v350_v3  ;;  %2661 = vmatpush3.msra.mxu1 %v354_v7  ;;  %v342_v12 = vld [vmem:[%s299_s3] sm:$0xff]  ;;  %v857_v16 = vld [vmem:[#allocation10 + $0x68] sm:$0xff]  ;;  %v856_v17 = vld [vmem:[#allocation10 + $0x60] sm:$0xff]  ;;  %v513_v33 = vunpack.c.0.s8 %v512_v31  ;;  %v3543_v50 = vsub.s32 0, %v3534_v34  ;;  %vm2068_vm6 = vcmask 392512   ;;  %vm2075_vm7 = vcmask 458112  }
  0x54   : > { %386 = vmatpush1.msra.mxu0 %v349_v4  ;;  %2662 = vmatprep.subr.mxu1 %v3350_v0  ;;  %v345_v13 = vld [vmem:[#allocation8 + $0x10] sm:$0xff]  ;;  %v859_v14 = vld [vmem:[#allocation10 + $0x78] sm:$0xff]  ;;  %v853_v20 = vld [vmem:[#allocation10 + $0x48] sm:$0xff]  ;;  %vm2082_vm8 = vcmask 523712   ;;  %vm2357_vm9 = vcmask 1041409   ;;  %vm2359_vm10 = vcmask 1042434  }
  0x55   : > { %387 = vmatprep.subr.mxu0 %v347_v5  ;;  %2663 = vmatpush3.msra.mxu1 %v351_v8  ;;  %v858_v15 = vld [vmem:[#allocation10 + $0x70] sm:$0xff]  ;;  %v855_v18 = vld [vmem:[#allocation10 + $0x58] sm:$0xff]  ;;  %v852_v21 = vld [vmem:[#allocation10 + $0x40] sm:$0xff]  ;;  %v516_v36 = vsub.s32 %v513_v33, %v3534_v34  ;;  %vm2361_vm11 = vcmask 1043459   ;;  %vm2363_vm12 = vcmask 1044484   ;;  %vm2365_vm13 = vcmask 1045509  }
  0x56   : > { %388 = vmatpush1.msra.mxu0 %v346_v6  ;;  %2664 = vmatprep.subr.mxu1 %v3350_v0  ;;  %v854_v19 = vld [vmem:[#allocation10 + $0x50] sm:$0xff]  ;;  %v851_v22 = vld [vmem:[#allocation10 + $0x38] sm:$0xff]  ;;  %v849_v24 = vld [vmem:[#allocation10 + $0x28] sm:$0xff]  ;;  %vm2367_vm14 = vcmask 1046534   ;;  %vm2369_vm15 = vcmask 1047559   ;;  %s2572_s16 = sshll.u32 %s3333_s29, 7 }
  0x57   : > { %389 = vmatprep.subr.mxu0 %v344_v9  ;;  %2665 = vmatpush3.msra.mxu1 %v348_v11  ;;  %v850_v23 = vld [vmem:[#allocation10 + $0x30] sm:$0xff]  ;;  %v848_v25 = vld [vmem:[#allocation10 + $0x20] sm:$0xff]  ;;  %v847_v26 = vld [vmem:[#allocation10 + $0x18] sm:$0xff]  ;;  %s337_s11 = scalar_lea.vmem [#allocation11], %s2498_s19  ;;  %vm2372_vm0 = vcmask 523264   ;;  %s4290_s23 = scalar_lea.hbm %s4339_s7, %s2572_s16 }
  0x58   : > { %390 = vmatpush1.msra.mxu0 %v343_v10  ;;  %2666 = vmatprep.subr.mxu1 %v3350_v0  ;;  %v846_v27 = vld [vmem:[#allocation10 + $0x10] sm:$0xff]  ;;  %v845_v28 = vld [vmem:[#allocation10 + $0x8] sm:$0xff]  ;;  %v844_v29 = vld [vmem:[#allocation10] sm:$0xff]  ;;  %s2389_s17 = sshll.u32 %s337_s11, 4  ;;  %s2375_s19 = scalar_lea.sflag [#allocation7], %s3519_s22  ;;  %s2390_s17 = int_to_ptr.vmem [resolvable:$true] %s2389_s17 }
  0x59   : > { %2502 = vmatmul.mubr.msk.f32.vlgmr.msra.gmra.mxu0 %vm355_vm1, %v342_v12  ;;  %2667 = vmatpush3.msra.mxu1 %v345_v13  ;;  %v2504_v35 = vld [vmem:[%s4334_s2] ss:$0 sm:$0xff]  ;;  %s3257_s25 = scalar_lea.vmem %s2390_s17, 128  ;;  %s3353_s3 = smov [#allocation11]  }
  0x5a   : > { %2671 = vmatprep.subr.mxu0 %v859_v14  ;;  %2669 = vmatmul.mubr.msk.f32.vlgmr.msra.gmra.mxu1 %vm355_vm1, %v342_v12  ;;  %p3258_p8 = scmp.ne.s32.totalorder %s2390_s17, %s3257_s25  ;;  %s3261_s1 = sshll.u32 %s3353_s3, 4  ;;  %s3262_s1 = int_to_ptr.vmem [resolvable:$false] %s3261_s1 }
  0x5b   : > { %2799 = vmatprep.subr.mxu1 %v859_v14  ;;  %2672 = vmatpush3.msra.mxu0 %v859_v14  ;;  %s3263_s10 = scalar_lea.vmem %s3262_s1, 256  ;;  %p3264_p2 = scmp.lt.s32.totalorder %s2390_s17, %s3262_s1 }
  0x5c   : > { %2815 = vmatpush3.msra.mxu1 %v859_v14  ;;  %2673 = vmatprep.subr.mxu0 %v858_v15  ;;  %p3259_p9 = pnand %p3258_p8, %p3492_p7  ;;  %p3265_p13 = scmp.lt.s32.totalorder %s3263_s10, %s3257_s25 }
  0x5d   : > { %2800 = vmatprep.subr.mxu1 %v858_v15  ;;  %2674 = vmatpush3.msra.mxu0 %v858_v15 }
  0x5e   : > { %2816 = vmatpush3.msra.mxu1 %v858_v15  ;;  %2675 = vmatprep.subr.mxu0 %v857_v16  ;;  %p3260_p11 = pneg %p3259_p9  ;;  %p3266_p0 = por %p3265_p13, %p3264_p2 }
  0x5f   : > { %2801 = vmatprep.subr.mxu1 %v857_v16  ;;  %2676 = vmatpush3.msra.mxu0 %v857_v16 }
  0x60   : > { %2817 = vmatpush3.msra.mxu1 %v857_v16  ;;  %2677 = vmatprep.subr.mxu0 %v856_v17  ;;  %p3267_p5 = pnand %p3266_p0, %p3260_p11 }
  0x61   : > { %2802 = vmatprep.subr.mxu1 %v856_v17  ;;  %2678 = vmatpush3.msra.mxu0 %v856_v17 }
  0x62   : > { %2818 = vmatpush3.msra.mxu1 %v856_v17  ;;  %2679 = vmatprep.subr.mxu0 %v855_v18 }
  0x63   : > { %2803 = vmatprep.subr.mxu1 %v855_v18  ;;  %2680 = vmatpush3.msra.mxu0 %v855_v18 }
  0x64   : > { %2819 = vmatpush3.msra.mxu1 %v855_v18  ;;  %2681 = vmatprep.subr.mxu0 %v854_v19 }
  0x65   : > { %2804 = vmatprep.subr.mxu1 %v854_v19  ;;  %2682 = vmatpush3.msra.mxu0 %v854_v19 }
  0x66   : > { %2820 = vmatpush3.msra.mxu1 %v854_v19  ;;  %2683 = vmatprep.subr.mxu0 %v853_v20 }
  0x67   : > { %2805 = vmatprep.subr.mxu1 %v853_v20  ;;  %2684 = vmatpush3.msra.mxu0 %v853_v20 }
  0x68   : > { %2821 = vmatpush3.msra.mxu1 %v853_v20  ;;  %2685 = vmatprep.subr.mxu0 %v852_v21 }
  0x69   : > { %2806 = vmatprep.subr.mxu1 %v852_v21  ;;  %2686 = vmatpush3.msra.mxu0 %v852_v21 }
  0x6a   : > { %2822 = vmatpush3.msra.mxu1 %v852_v21  ;;  %2687 = vmatprep.subr.mxu0 %v851_v22 }
  0x6b   : > { %2807 = vmatprep.subr.mxu1 %v851_v22  ;;  %2688 = vmatpush3.msra.mxu0 %v851_v22 }
  0x6c   : > { %2823 = vmatpush3.msra.mxu1 %v851_v22  ;;  %2689 = vmatprep.subr.mxu0 %v850_v23 }
  0x6d   : > { %2808 = vmatprep.subr.mxu1 %v850_v23  ;;  %2690 = vmatpush3.msra.mxu0 %v850_v23 }
  0x6e   : > { %2824 = vmatpush3.msra.mxu1 %v850_v23  ;;  %2691 = vmatprep.subr.mxu0 %v849_v24 }
  0x6f   : > { %2809 = vmatprep.subr.mxu1 %v849_v24  ;;  %2692 = vmatpush3.msra.mxu0 %v849_v24 }
  0x70   : > { %2825 = vmatpush3.msra.mxu1 %v849_v24  ;;  %2693 = vmatprep.subr.mxu0 %v848_v25 }
  0x71   : > { %2810 = vmatprep.subr.mxu1 %v848_v25  ;;  %2694 = vmatpush3.msra.mxu0 %v848_v25 }
  0x72   : > { %2826 = vmatpush3.msra.mxu1 %v848_v25  ;;  %2695 = vmatprep.subr.mxu0 %v847_v26 }
  0x73   : > { %2811 = vmatprep.subr.mxu1 %v847_v26  ;;  %2696 = vmatpush3.msra.mxu0 %v847_v26 }
  0x74   : > { %2827 = vmatpush3.msra.mxu1 %v847_v26  ;;  %2697 = vmatprep.subr.mxu0 %v846_v27 }
  0x75   : > { %2812 = vmatprep.subr.mxu1 %v846_v27  ;;  %2698 = vmatpush3.msra.mxu0 %v846_v27 }
  0x76   : > { %2828 = vmatpush3.msra.mxu1 %v846_v27  ;;  %2699 = vmatprep.subr.mxu0 %v845_v28 }
  0x77   : > { %2813 = vmatprep.subr.mxu1 %v845_v28  ;;  %2700 = vmatpush3.msra.mxu0 %v845_v28 }
  0x78   : > { %2829 = vmatpush3.msra.mxu1 %v845_v28  ;;  %2701 = vmatprep.subr.mxu0 %v844_v29 }
  0x79   : > { %2814 = vmatprep.subr.mxu1 %v844_v29  ;;  %2702 = vmatpush3.msra.mxu0 %v844_v29 }
  0x7a   : > { %2830 = vmatpush3.msra.mxu1 %v844_v29 }
 0x119   : > { %v425_v37 = vpop.f32.mrf.mxu0 }
 0x11a   : > { %v507_v38 = vadd.f32 %v2504_v35, %v425_v37  ;;  %v3540_v40 = vpop.f32.mrf.mxu1 }
 0x11b   : > { %v427_v39 = vpop.f32.mrf.mxu0 }
 0x11c   : > { %v619_v41 = vcombine.high %v507_v38, %v507_v38  ;;  %v510_v42 = vcombine.high %v427_v39, %v427_v39  ;;  %v517_v43 = vrot.slane %v427_v39, %v516_v36  ;;  %v2670_v44 = vpop.f32.mrf.mxu1  ;;  %v626_v47 = vrot.slane %v507_v38, %v516_v36 }
 0x11e   : > { %v633_v45 = vrot.slane %v619_v41, %v516_v36  ;;  %v524_v46 = vrot.slane %v510_v42, %v516_v36  ;;  %v525_v48 = vcombine.high %v517_v43, %v517_v43  ;;  %v533_v49 = vrot.slane %v517_v43, %v516_v36 }
 0x11f   : > { %v634_v55 = vcombine.high %v626_v47, %v626_v47  ;;  %v3547_v58 = vrot.slane %v626_v47, %v516_v36 }
 0x120   : > { %v526_v51 = vcombine.high %v524_v46, %v524_v46  ;;  %v540_v52 = vrot.slane %v524_v46, %v516_v36  ;;  %v547_v53 = vrot.slane %v525_v48, %v516_v36  ;;  %v3545_v54 = vrot.slane %v633_v45, %v516_v36 }
 0x121   : > { %v555_v57 = vcombine.high %v533_v49, %v533_v49  ;;  %v635_v59 = vcombine.high %v633_v45, %v633_v45  ;;  %v562_v62 = vrot.slane %v533_v49, %v3543_v50  ;;  %v3555_v3 = vrot.slane %v634_v55, %v516_v36 }
 0x122   : > { %v554_v56 = vrot.slane %v526_v51, %v516_v36  ;;  %v556_v60 = vcombine.high %v540_v52, %v540_v52  ;;  %v557_v61 = vcombine.high %v547_v53, %v547_v53  ;;  %v695_v63 = vrot.slane %v3545_v54, %v3543_v50 }
 0x123   : > { %v566_v0 = vrot.slane %v547_v53, %v3543_v50  ;;  %v570_v1 = vrot.slane %v555_v57, %v3543_v50  ;;  %v578_v2 = vrot.slane %v540_v52, %v3543_v50  ;;  %v679_v7 = vrot.slane %v3547_v58, %v3543_v50 }
 0x124   : > { %v558_v4 = vcombine.high %v554_v56, %v554_v56  ;;  %v574_v5 = vrot.slane %v557_v61, %v3543_v50  ;;  %v582_v6 = vrot.slane %v554_v56, %v3543_v50  ;;  %v3562_v8 = vadd.f32 %v562_v62, %v3540_v40 }
 0x125   : > { %v3565_v9 = vadd.f32 %v566_v0, %v3540_v40  ;;  %v3568_v10 = vadd.f32 %v570_v1, %v3540_v40  ;;  %v3570_v11 = vrot.slane %v635_v59, %v516_v36  ;;  %v586_v12 = vrot.slane %v556_v60, %v3543_v50 }
 0x126   : > { %v3574_v13 = vadd.f32 %v574_v5, %v3540_v40  ;;  %v3577_v14 = vadd.f32 %v578_v2, %v3540_v40  ;;  %v716_v15 = vadd.f32 %v679_v7, %v3562_v8  ;;  %v748_v16 = vadd.f32 %v695_v63, %v3562_v8 }
 0x127   : > { %v717_v17 = vadd.f32 %v679_v7, %v3565_v9  ;;  %v749_v18 = vadd.f32 %v695_v63, %v3565_v9  ;;  %v590_v19 = vrot.slane %v558_v4, %v3543_v50  ;;  %v3585_v20 = vadd.f32 %v582_v6, %v3540_v40 }
 0x128   : > { %v718_v21 = vadd.f32 %v679_v7, %v3568_v10  ;;  %v750_v22 = vadd.f32 %v695_v63, %v3568_v10  ;;  %v780_v23 = vmax.f32 %v716_v15, 0.0  ;;  %v812_v24 = vmax.f32 %v748_v16, 0.0 }
 0x129   : > { %v781_v25 = vmax.f32 %v717_v17, 0.0  ;;  %v813_v26 = vmax.f32 %v749_v18, 0.0  ;;  %v719_v29 = vadd.f32 %v679_v7, %v3574_v13  ;;  %v751_v30 = vadd.f32 %v695_v63, %v3574_v13 }
 0x12a   : > { %v782_v27 = vmax.f32 %v718_v21, 0.0  ;;  %v814_v28 = vmax.f32 %v750_v22, 0.0  ;;  %v3592_v31 = vadd.f32 %v586_v12, %v3540_v40  ;;  %2703 = vmatprep.mubr.f32.mxu0 %v780_v23  ;;  %2751 = vmatprep.mubr.f32.mxu1 %v812_v24  ;;  %v720_v33 = vadd.f32 %v679_v7, %v3577_v14 }
 0x12b   : > { %v752_v35 = vadd.f32 %v695_v63, %v3577_v14  ;;  %2704 = vmatmul.mubr.f32.vlgmr.msra.gmra.mxu0 %v781_v25  ;;  %2752 = vmatmul.mubr.f32.vlgmr.msra.gmra.mxu1 %v813_v26  ;;  %v3598_v36 = vrot.slane %v3555_v3, %v3543_v50  ;;  %v3602_v37 = vrot.slane %v3570_v11, %v3543_v50  ;;  %v783_v39 = vmax.f32 %v719_v29, 0.0 }
 0x12c   : > { %v3605_v38 = vadd.f32 %v590_v19, %v3540_v40  ;;  %2706 = vmatprep.mubr.f32.mxu0 %v782_v27  ;;  %2754 = vmatprep.mubr.f32.mxu1 %v814_v28  ;;  %v815_v41 = vmax.f32 %v751_v30, 0.0  ;;  %v721_v42 = vadd.f32 %v679_v7, %v3585_v20  ;;  %v753_v43 = vadd.f32 %v695_v63, %v3585_v20 }
 0x12d   : > { %v784_v44 = vmax.f32 %v720_v33, 0.0  ;;  %v816_v45 = vmax.f32 %v752_v35, 0.0  ;;  %v722_v46 = vadd.f32 %v679_v7, %v3592_v31  ;;  %v754_v47 = vadd.f32 %v695_v63, %v3592_v31 }
 0x12e   : > { %v785_v40 = vmax.f32 %v721_v42, 0.0  ;;  %v817_v48 = vmax.f32 %v753_v43, 0.0  ;;  %v723_v49 = vadd.f32 %v679_v7, %v3605_v38  ;;  %v755_v51 = vadd.f32 %v695_v63, %v3605_v38 }
 0x12f   : > { %2707 = vmatmul.mubr.f32.gmra.mxu0 %v783_v39  ;;  %2755 = vmatmul.mubr.f32.gmra.mxu1 %v815_v41  ;;  %v786_v52 = vmax.f32 %v722_v46, 0.0  ;;  %v818_v53 = vmax.f32 %v754_v47, 0.0  ;;  %v724_v55 = vadd.f32 %v3598_v36, %v3562_v8  ;;  %v756_v56 = vadd.f32 %v3602_v37, %v3562_v8 }
 0x130   : > { %2709 = vmatprep.mubr.f32.mxu0 %v784_v44  ;;  %2757 = vmatprep.mubr.f32.mxu1 %v816_v45  ;;  %v787_v57 = vmax.f32 %v723_v49, 0.0  ;;  %v819_v59 = vmax.f32 %v755_v51, 0.0  ;;  %v725_v60 = vadd.f32 %v3598_v36, %v3565_v9  ;;  %v757_v61 = vadd.f32 %v3602_v37, %v3565_v9 }
 0x131   : > { %v788_v62 = vmax.f32 %v724_v55, 0.0  ;;  %v820_v63 = vmax.f32 %v756_v56, 0.0  ;;  %v726_v0 = vadd.f32 %v3598_v36, %v3568_v10  ;;  %v758_v1 = vadd.f32 %v3602_v37, %v3568_v10 }
 0x132   : > { %v664_v2 = vcombine.high %v3547_v58, %v3547_v58  ;;  %v665_v4 = vcombine.high %v3545_v54, %v3545_v54  ;;  %v789_v5 = vmax.f32 %v725_v60, 0.0  ;;  %v821_v6 = vmax.f32 %v757_v61, 0.0 }
 0x133   : > { %2710 = vmatmul.mubr.f32.gmra.mxu0 %v785_v40  ;;  %2758 = vmatmul.mubr.f32.gmra.mxu1 %v817_v48  ;;  %v727_v7 = vadd.f32 %v3598_v36, %v3574_v13  ;;  %v759_v12 = vadd.f32 %v3602_v37, %v3574_v13  ;;  %v790_v15 = vmax.f32 %v726_v0, 0.0  ;;  %v822_v16 = vmax.f32 %v758_v1, 0.0 }
 0x134   : > { %2712 = vmatprep.mubr.f32.mxu0 %v786_v52  ;;  %2760 = vmatprep.mubr.f32.mxu1 %v818_v53  ;;  %v728_v17 = vadd.f32 %v3598_v36, %v3577_v14  ;;  %v760_v58 = vadd.f32 %v3602_v37, %v3577_v14  ;;  %v3638_v54 = vrot.slane %v664_v2, %v3543_v50 }
 0x135   : > { %v3641_v18 = vrot.slane %v665_v4, %v3543_v50  ;;  %v791_v19 = vmax.f32 %v727_v7, 0.0  ;;  %v823_v21 = vmax.f32 %v759_v12, 0.0  ;;  %v729_v22 = vadd.f32 %v3598_v36, %v3585_v20 }
 0x136   : > { %v761_v23 = vadd.f32 %v3602_v37, %v3585_v20  ;;  %v792_v24 = vmax.f32 %v728_v17, 0.0  ;;  %v824_v25 = vmax.f32 %v760_v58, 0.0  ;;  %v730_v26 = vadd.f32 %v3598_v36, %v3592_v31 }
 0x137   : > { %2713 = vmatmul.mubr.f32.gmra.mxu0 %v787_v57  ;;  %2761 = vmatmul.mubr.f32.gmra.mxu1 %v819_v59  ;;  %v762_v27 = vadd.f32 %v3602_v37, %v3592_v31  ;;  %v793_v28 = vmax.f32 %v729_v22, 0.0  ;;  %v731_v30 = vadd.f32 %v3598_v36, %v3605_v38  ;;  %v763_v33 = vadd.f32 %v3602_v37, %v3605_v38 }
 0x138   : > { %2715 = vmatprep.mubr.f32.mxu0 %v788_v62  ;;  %2763 = vmatprep.mubr.f32.mxu1 %v820_v63  ;;  %v825_v29 = vmax.f32 %v761_v23, 0.0  ;;  %v794_v35 = vmax.f32 %v730_v26, 0.0  ;;  %v732_v41 = vadd.f32 %v3638_v54, %v3562_v8  ;;  %v764_v42 = vadd.f32 %v3641_v18, %v3562_v8 }
 0x139   : > { %v826_v39 = vmax.f32 %v762_v27, 0.0  ;;  %v795_v43 = vmax.f32 %v731_v30, 0.0  ;;  %v827_v44 = vmax.f32 %v763_v33, 0.0  ;;  %v733_v36 = vadd.f32 %v3638_v54, %v3565_v9 }
 0x13a   : > { %v765_v37 = vadd.f32 %v3641_v18, %v3565_v9  ;;  %v796_v45 = vmax.f32 %v732_v41, 0.0  ;;  %v828_v46 = vmax.f32 %v764_v42, 0.0  ;;  %v734_v47 = vadd.f32 %v3638_v54, %v3568_v10 }
 0x13b   : > { %2716 = vmatmul.mubr.f32.gmra.mxu0 %v789_v5  ;;  %2764 = vmatmul.mubr.f32.gmra.mxu1 %v821_v6  ;;  %v766_v40 = vadd.f32 %v3641_v18, %v3568_v10  ;;  %v666_v48 = vcombine.high %v3555_v3, %v3555_v3  ;;  %v667_v49 = vcombine.high %v3570_v11, %v3570_v11  ;;  %v797_v51 = vmax.f32 %v733_v36, 0.0 }
 0x13c   : > { %2718 = vmatprep.mubr.f32.mxu0 %v790_v15  ;;  %2766 = vmatprep.mubr.f32.mxu1 %v822_v16  ;;  %v829_v52 = vmax.f32 %v765_v37, 0.0  ;;  %v735_v53 = vadd.f32 %v3638_v54, %v3574_v13  ;;  %v767_v55 = vadd.f32 %v3641_v18, %v3574_v13  ;;  %v798_v56 = vmax.f32 %v734_v47, 0.0 }
 0x13d   : > { %v830_v57 = vmax.f32 %v766_v40, 0.0  ;;  %v736_v59 = vadd.f32 %v3638_v54, %v3577_v14  ;;  %v768_v3 = vadd.f32 %v3641_v18, %v3577_v14  ;;  %v3680_v11 = vrot.slane %v666_v48, %v3543_v50  ;;  %v3732_v40 = vld [vmem:[%s4336_s4] ss:$0 sm:$0xff] }
 0x13e   : > { %v3683_v60 = vrot.slane %v667_v49, %v3543_v50  ;;  %v799_v61 = vmax.f32 %v735_v53, 0.0  ;;  %v831_v62 = vmax.f32 %v767_v55, 0.0  ;;  %v737_v63 = vadd.f32 %v3638_v54, %v3585_v20 }
 0x13f   : > { %2719 = vmatmul.mubr.f32.gmra.mxu0 %v791_v19  ;;  %2767 = vmatmul.mubr.f32.gmra.mxu1 %v823_v21  ;;  %v769_v0 = vadd.f32 %v3641_v18, %v3585_v20  ;;  %v800_v1 = vmax.f32 %v736_v59, 0.0  ;;  %v832_v2 = vmax.f32 %v768_v3, 0.0  ;;  %v738_v4 = vadd.f32 %v3638_v54, %v3592_v31 }
 0x140   : > { %2721 = vmatprep.mubr.f32.mxu0 %v792_v24  ;;  %2769 = vmatprep.mubr.f32.mxu1 %v824_v25  ;;  %v770_v5 = vadd.f32 %v3641_v18, %v3592_v31  ;;  %v801_v50 = vmax.f32 %v737_v63, 0.0  ;;  %v739_v7 = vadd.f32 %v3638_v54, %v3605_v38  ;;  %v771_v12 = vadd.f32 %v3641_v18, %v3605_v38 }
 0x141   : > { %v833_v6 = vmax.f32 %v769_v0, 0.0  ;;  %v802_v15 = vmax.f32 %v738_v4, 0.0  ;;  %v740_v17 = vadd.f32 %v3680_v11, %v3562_v8  ;;  %v772_v58 = vadd.f32 %v3683_v60, %v3562_v8 }
 0x142   : > { %v834_v16 = vmax.f32 %v770_v5, 0.0  ;;  %v803_v19 = vmax.f32 %v739_v7, 0.0  ;;  %v835_v21 = vmax.f32 %v771_v12, 0.0  ;;  %v741_v54 = vadd.f32 %v3680_v11, %v3565_v9 }
 0x143   : > { %2722 = vmatmul.mubr.f32.gmra.mxu0 %v793_v28  ;;  %2770 = vmatmul.mubr.f32.gmra.mxu1 %v825_v29  ;;  %v773_v18 = vadd.f32 %v3683_v60, %v3565_v9  ;;  %v804_v22 = vmax.f32 %v740_v17, 0.0  ;;  %v836_v23 = vmax.f32 %v772_v58, 0.0  ;;  %v742_v24 = vadd.f32 %v3680_v11, %v3568_v10 }
 0x144   : > { %2724 = vmatprep.mubr.f32.mxu0 %v794_v35  ;;  %2772 = vmatprep.mubr.f32.mxu1 %v826_v39  ;;  %v774_v8 = vadd.f32 %v3683_v60, %v3568_v10  ;;  %v805_v25 = vmax.f32 %v741_v54, 0.0  ;;  %v743_v27 = vadd.f32 %v3680_v11, %v3574_v13  ;;  %v775_v9 = vadd.f32 %v3683_v60, %v3574_v13 }
 0x145   : > { %v837_v26 = vmax.f32 %v773_v18, 0.0  ;;  %v806_v28 = vmax.f32 %v742_v24, 0.0  ;;  %v744_v30 = vadd.f32 %v3680_v11, %v3577_v14  ;;  %v776_v10 = vadd.f32 %v3683_v60, %v3577_v14 }
 0x146   : > { %v838_v29 = vmax.f32 %v774_v8, 0.0  ;;  %v807_v33 = vmax.f32 %v743_v27, 0.0  ;;  %v839_v35 = vmax.f32 %v775_v9, 0.0  ;;  %v745_v39 = vadd.f32 %v3680_v11, %v3585_v20 }
 0x147   : > { %2725 = vmatmul.mubr.f32.gmra.mxu0 %v795_v43  ;;  %2773 = vmatmul.mubr.f32.gmra.mxu1 %v827_v44  ;;  %v777_v13 = vadd.f32 %v3683_v60, %v3585_v20  ;;  %v808_v41 = vmax.f32 %v744_v30, 0.0  ;;  %v840_v42 = vmax.f32 %v776_v10, 0.0  ;;  %v746_v43 = vadd.f32 %v3680_v11, %v3592_v31 }
 0x148   : > { %2727 = vmatprep.mubr.f32.mxu0 %v796_v45  ;;  %2775 = vmatprep.mubr.f32.mxu1 %v828_v46  ;;  %v778_v14 = vadd.f32 %v3683_v60, %v3592_v31  ;;  %v809_v44 = vmax.f32 %v745_v39, 0.0  ;;  %v747_v37 = vadd.f32 %v3680_v11, %v3605_v38  ;;  %v779_v20 = vadd.f32 %v3683_v60, %v3605_v38 }
 0x149   : > { %v841_v36 = vmax.f32 %v777_v13, 0.0  ;;  %v810_v45 = vmax.f32 %v746_v43, 0.0 }
 0x14a   : > { %v842_v46 = vmax.f32 %v778_v14, 0.0  ;;  %v811_v47 = vmax.f32 %v747_v37, 0.0  ;;  %v843_v31 = vmax.f32 %v779_v20, 0.0 }
 0x14b   : > { %2728 = vmatmul.mubr.f32.gmra.mxu0 %v797_v51  ;;  %2776 = vmatmul.mubr.f32.gmra.mxu1 %v829_v52 }
 0x14c   : > { %2730 = vmatprep.mubr.f32.mxu0 %v798_v56  ;;  %2778 = vmatprep.mubr.f32.mxu1 %v830_v57  ;;  %v3740_v57 = vld [vmem:[%s4337_s5] ss:$0 sm:$0xff] }
 0x14f   : > { %2731 = vmatmul.mubr.f32.gmra.mxu0 %v799_v61  ;;  %2779 = vmatmul.mubr.f32.gmra.mxu1 %v831_v62 }
 0x150   : > { %2733 = vmatprep.mubr.f32.mxu0 %v800_v1  ;;  %2781 = vmatprep.mubr.f32.mxu1 %v832_v2 }
 0x153   : > { %2734 = vmatmul.mubr.f32.gmra.mxu0 %v801_v50  ;;  %2782 = vmatmul.mubr.f32.gmra.mxu1 %v833_v6 }
 0x154   : > { %2736 = vmatprep.mubr.f32.mxu0 %v802_v15  ;;  %2784 = vmatprep.mubr.f32.mxu1 %v834_v16 }
 0x157   : > { %2737 = vmatmul.mubr.f32.gmra.mxu0 %v803_v19  ;;  %2785 = vmatmul.mubr.f32.gmra.mxu1 %v835_v21 }
 0x158   : > { %2739 = vmatprep.mubr.f32.mxu0 %v804_v22  ;;  %2787 = vmatprep.mubr.f32.mxu1 %v836_v23 }
 0x15b   : > { %2740 = vmatmul.mubr.f32.gmra.mxu0 %v805_v25  ;;  %2788 = vmatmul.mubr.f32.gmra.mxu1 %v837_v26 }
 0x15c   : > { %2742 = vmatprep.mubr.f32.mxu0 %v806_v28  ;;  %2790 = vmatprep.mubr.f32.mxu1 %v838_v29 }
 0x15f   : > { %2743 = vmatmul.mubr.f32.gmra.mxu0 %v807_v33  ;;  %2791 = vmatmul.mubr.f32.gmra.mxu1 %v839_v35 }
 0x160   : > { %2745 = vmatprep.mubr.f32.mxu0 %v808_v41  ;;  %2793 = vmatprep.mubr.f32.mxu1 %v840_v42 }
 0x163   : > { %2746 = vmatmul.mubr.f32.gmra.mxu0 %v809_v44  ;;  %2794 = vmatmul.mubr.f32.gmra.mxu1 %v841_v36 }
 0x164   : > { %2748 = vmatprep.mubr.f32.mxu0 %v810_v45  ;;  %2796 = vmatprep.mubr.f32.mxu1 %v842_v46 }
 0x167   : > { %2749 = vmatmul.mubr.f32.gmra.mxu0 %v811_v47  ;;  %2797 = vmatmul.mubr.f32.gmra.mxu1 %v843_v31 }
 0x1eb   : > { %v2705_v48 = vpop.f32.mrf.mxu0  ;;  %v2753_v49 = vpop.f32.mrf.mxu1 }
 0x1ec   : > { %v939_v51 = vadd.f32 %v2705_v48, %v3732_v40  ;;  %v1099_v38 = vadd.f32 %v2753_v49, %v3732_v40 }
 0x1ed   : > { %v933_v52 = vpop.f32.mrf.mxu0  ;;  %v1093_v53 = vpop.f32.mrf.mxu1 }
 0x1ee   : > { %v1253_v55 = vmax.f32 %v939_v51, 0.0  ;;  %v1094_v56 = vadd.f32 %v3732_v40, %v1093_v53  ;;  %v1285_v61 = vmax.f32 %v1099_v38, 0.0  ;;  %v934_v62 = vadd.f32 %v3732_v40, %v933_v52 }
 0x1ef   : > { %v2708_v59 = vpop.f32.mrf.mxu0  ;;  %v2756_v3 = vpop.f32.mrf.mxu1 }
 0x1f0   : > { %v1284_v11 = vmax.f32 %v1094_v56, 0.0  ;;  %v949_v60 = vadd.f32 %v2708_v59, %v3732_v40  ;;  %v1324_v1 = vmul.f32 %v3740_v57, %v1253_v55  ;;  %v1252_v7 = vmax.f32 %v934_v62, 0.0 }
 0x1f1   : > { %v943_v63 = vpop.f32.mrf.mxu0  ;;  %v1103_v0 = vpop.f32.mrf.mxu1  ;;  %v1109_v12 = vadd.f32 %v2756_v3, %v3732_v40  ;;  %v1356_v17 = vmul.f32 %v3740_v57, %v1285_v61 }
 0x1f2   : > { %v1255_v2 = vmax.f32 %v949_v60, 0.0  ;;  %v944_v4 = vadd.f32 %v3732_v40, %v943_v63  ;;  %1389 = vadd.xlane.f32.xlu0 %v1324_v1  ;;  %v1355_v6 = vmul.f32 %v3740_v57, %v1284_v11  ;;  %v1104_v19 = vadd.f32 %v3732_v40, %v1103_v0 }
 0x1f3   : > { %v2711_v5 = vpop.f32.mrf.mxu0  ;;  %v2759_v50 = vpop.f32.mrf.mxu1  ;;  %v1287_v22 = vmax.f32 %v1109_v12, 0.0  ;;  %v1323_v25 = vmul.f32 %v3740_v57, %v1252_v7 }
 0x1f4   : > { %1451 = vadd.xlane.f32.xlu1 %v1355_v6  ;;  %v1254_v58 = vmax.f32 %v944_v4, 0.0  ;;  %v1326_v18 = vmul.f32 %v3740_v57, %v1255_v2  ;;  %v1286_v26 = vmax.f32 %v1104_v19, 0.0  ;;  %v959_v27 = vadd.f32 %v2711_v5, %v3732_v40 }
 0x1f5   : > { %v953_v15 = vpop.f32.mrf.mxu0  ;;  %v1113_v16 = vpop.f32.mrf.mxu1  ;;  %v1358_v39 = vmul.f32 %v3740_v57, %v1287_v22  ;;  %v1119_v41 = vadd.f32 %v2759_v50, %v3732_v40 }
 0x1f6   : > { %1453 = vadd.xlane.f32.xlu0 %v1356_v17  ;;  %v1114_v23 = vadd.f32 %v3732_v40, %v1113_v16  ;;  %v1325_v29 = vmul.f32 %v3740_v57, %v1254_v58  ;;  %v1257_v13 = vmax.f32 %v959_v27, 0.0  ;;  %v1357_v14 = vmul.f32 %v3740_v57, %v1286_v26 }
 0x1f7   : > { %v2714_v21 = vpop.f32.mrf.mxu0  ;;  %v2762_v54 = vpop.f32.mrf.mxu1  ;;  %v954_v46 = vadd.f32 %v3732_v40, %v953_v15  ;;  %v1289_v47 = vmax.f32 %v1119_v41, 0.0 }
 0x1f8   : > { %1393 = vadd.xlane.f32.xlu1 %v1326_v18  ;;  %v1288_v30 = vmax.f32 %v1114_v23, 0.0  ;;  %v969_v10 = vadd.f32 %v2714_v21, %v3732_v40  ;;  %v1129_v36 = vadd.f32 %v2762_v54, %v3732_v40  ;;  %v1328_v49 = vmul.f32 %v3740_v57, %v1257_v13 }
 0x1f9   : > { %v963_v24 = vpop.f32.mrf.mxu0  ;;  %v1123_v8 = vpop.f32.mrf.mxu1  ;;  %v1256_v11 = vmax.f32 %v954_v46, 0.0  ;;  %v1360_v0 = vmul.f32 %v3740_v57, %v1289_v47 }
 0x1fa   : > { %1387 = vadd.xlane.f32.xlu0 %v1323_v25  ;;  %v1259_v44 = vmax.f32 %v969_v10, 0.0  ;;  %v1359_v45 = vmul.f32 %v3740_v57, %v1288_v30  ;;  %v964_v51 = vadd.f32 %v3732_v40, %v963_v24  ;;  %v1124_v38 = vadd.f32 %v3732_v40, %v1123_v8 }
 0x1fb   : > { %v2717_v9 = vpop.f32.mrf.mxu0  ;;  %v2765_v28 = vpop.f32.mrf.mxu1  ;;  %v1291_v52 = vmax.f32 %v1129_v36, 0.0  ;;  %v1327_v12 = vmul.f32 %v3740_v57, %v1256_v11 }
 0x1fc   : > { %1391 = vadd.xlane.f32.xlu1 %v1325_v29  ;;  %v979_v53 = vadd.f32 %v2717_v9, %v3732_v40  ;;  %v1139_v55 = vadd.f32 %v2765_v28, %v3732_v40  ;;  %v1330_v3 = vmul.f32 %v3740_v57, %v1259_v44  ;;  %v1258_v1 = vmax.f32 %v964_v51, 0.0 }
 0x1fd   : > { %v973_v33 = vpop.f32.mrf.mxu0  ;;  %v1133_v35 = vpop.f32.mrf.mxu1  ;;  %v1290_v2 = vmax.f32 %v1124_v38, 0.0  ;;  %v1362_v7 = vmul.f32 %v3740_v57, %v1291_v52 }
 0x1fe   : > { %1457 = vadd.xlane.f32.xlu0 %v1358_v39  ;;  %v974_v60 = vadd.f32 %v3732_v40, %v973_v33  ;;  %v1134_v61 = vadd.f32 %v3732_v40, %v1133_v35  ;;  %v1261_v4 = vmax.f32 %v979_v53, 0.0  ;;  %v1293_v5 = vmax.f32 %v1139_v55, 0.0 }
 0x1ff   : > { %v2720_v42 = vpop.f32.mrf.mxu0  ;;  %v2768_v43 = vpop.f32.mrf.mxu1  ;;  %v1329_v22 = vmul.f32 %v3740_v57, %v1258_v1  ;;  %v1361_v23 = vmul.f32 %v3740_v57, %v1290_v2 }
 0x200   : > { %1455 = vadd.xlane.f32.xlu1 %v1357_v14  ;;  %v1260_v15 = vmax.f32 %v974_v60, 0.0  ;;  %v1292_v16 = vmax.f32 %v1134_v61, 0.0  ;;  %v989_v17 = vadd.f32 %v2720_v42, %v3732_v40  ;;  %v1149_v58 = vadd.f32 %v2768_v43, %v3732_v40 }
 0x201   : > { %v983_v37 = vpop.f32.mrf.mxu0  ;;  %v1143_v20 = vpop.f32.mrf.mxu1  ;;  %v1332_v27 = vmul.f32 %v3740_v57, %v1261_v4  ;;  %v1364_v9 = vmul.f32 %v3740_v57, %v1293_v5 }
 0x202   : > { %1459 = vadd.xlane.f32.xlu0 %v1359_v45  ;;  %v3796_v24 = vadd.f32 %v3732_v40, %v983_v37  ;;  %v3799_v8 = vadd.f32 %v3732_v40, %v1143_v20  ;;  %v1263_v33 = vmax.f32 %v989_v17, 0.0  ;;  %v1295_v35 = vmax.f32 %v1149_v58, 0.0 }
 0x203   : > { %v3762_v31 = vpop.f32.mrf.mxu0  ;;  %v3764_v48 = vpop.f32.mrf.mxu1  ;;  %v1331_v41 = vmul.f32 %v3740_v57, %v1260_v15  ;;  %v1363_v42 = vmul.f32 %v3740_v57, %v1292_v16 }
 0x204   : > { %1397 = vadd.xlane.f32.xlu1 %v1328_v49  ;;  %v1262_v37 = vmax.f32 %v3796_v24, 0.0  ;;  %v1294_v20 = vmax.f32 %v3799_v8, 0.0  ;;  %v3821_v55 = vadd.f32 %v3762_v31, %v3732_v40 }
 0x205   : > { %v3771_v56 = vpop.f32.mrf.mxu0  ;;  %v3773_v59 = vpop.f32.mrf.mxu1 }
 0x206   : > { %1401 = vadd.xlane.f32.xlu0 %v1330_v3  ;;  %v3825_v3 = vadd.f32 %v3764_v48, %v3732_v40  ;;  %v1334_v48 = vmul.f32 %v3740_v57, %v1263_v33 }
 0x207   : > { %v3778_v62 = vpop.f32.mrf.mxu0  ;;  %v3780_v63 = vpop.f32.mrf.mxu1 }
 0x208   : > { %1461 = vadd.xlane.f32.xlu1 %v1360_v0 }
 0x209   : > { %v3783_v50 = vpop.f32.mrf.mxu0  ;;  %v3785_v6 = vpop.f32.mrf.mxu1 }
 0x20a   : > { %1465 = vadd.xlane.f32.xlu0 %v1362_v7 }
 0x20b   : > { %v2729_v19 = vpop.f32.mrf.mxu0  ;;  %v2777_v21 = vpop.f32.mrf.mxu1 }
 0x20c   : > { %v1019_v54 = vadd.f32 %v2729_v19, %v3732_v40  ;;  %v1179_v18 = vadd.f32 %v2777_v21, %v3732_v40  ;;  %1395 = vadd.xlane.f32.xlu1 %v1327_v12  ;;  %v1366_v12 = vmul.f32 %v3740_v57, %v1295_v35 }
 0x20d   : > { %v1013_v25 = vpop.f32.mrf.mxu0  ;;  %v1173_v26 = vpop.f32.mrf.mxu1 }
 0x20e   : > { %v1269_v28 = vmax.f32 %v1019_v54, 0.0  ;;  %v1301_v29 = vmax.f32 %v1179_v18, 0.0  ;;  %v1014_v30 = vadd.f32 %v3732_v40, %v1013_v25  ;;  %v1174_v10 = vadd.f32 %v3732_v40, %v1173_v26  ;;  %1399 = vadd.xlane.f32.xlu0 %v1329_v22 }
 0x20f   : > { %v2732_v39 = vpop.f32.mrf.mxu0  ;;  %v2780_v13 = vpop.f32.mrf.mxu1  ;;  %v1265_v54 = vmax.f32 %v3821_v55, 0.0  ;;  %v1297_v18 = vmax.f32 %v3825_v3, 0.0 }
 0x210   : > { %v1268_v43 = vmax.f32 %v1014_v30, 0.0  ;;  %v1300_v14 = vmax.f32 %v1174_v10, 0.0  ;;  %v1029_v44 = vadd.f32 %v2732_v39, %v3732_v40  ;;  %v1189_v36 = vadd.f32 %v2780_v13, %v3732_v40  ;;  %1405 = vadd.xlane.f32.xlu1 %v1332_v27 }
 0x211   : > { %v1023_v45 = vpop.f32.mrf.mxu0  ;;  %v1183_v46 = vpop.f32.mrf.mxu1  ;;  %v3812_v47 = vmul.f32 %v3740_v57, %v1269_v28  ;;  %v3815_v49 = vmul.f32 %v3740_v57, %v1301_v29  ;;  %v3857_v28 = vadd.f32 %v3732_v40, %v3771_v56  ;;  %v3861_v29 = vadd.f32 %v3732_v40, %v3773_v59 }
 0x212   : > { %v1271_v51 = vmax.f32 %v1029_v44, 0.0  ;;  %v1303_v38 = vmax.f32 %v1189_v36, 0.0  ;;  %v1024_v52 = vadd.f32 %v3732_v40, %v1023_v45  ;;  %v1184_v53 = vadd.f32 %v3732_v40, %v1183_v46  ;;  %1463 = vadd.xlane.f32.xlu0 %v1361_v23 }
 0x213   : > { %v2735_v11 = vpop.f32.mrf.mxu0  ;;  %v2783_v60 = vpop.f32.mrf.mxu1  ;;  %v3828_v61 = vmul.f32 %v3740_v57, %v1300_v14  ;;  %v3831_v0 = vmul.f32 %v3740_v57, %v1268_v43  ;;  %v1333_v59 = vmul.f32 %v3740_v57, %v1262_v37  ;;  %v1365_v44 = vmul.f32 %v3740_v57, %v1294_v20 }
 0x214   : > { %v1270_v1 = vmax.f32 %v1024_v52, 0.0  ;;  %v1302_v2 = vmax.f32 %v1184_v53, 0.0  ;;  %v1039_v4 = vadd.f32 %v2735_v11, %v3732_v40  ;;  %v1199_v31 = vadd.f32 %v2783_v60, %v3732_v40  ;;  %1469 = vadd.xlane.f32.xlu1 %v1364_v9 }
 0x215   : > { %v1033_v5 = vpop.f32.mrf.mxu0  ;;  %v1193_v7 = vpop.f32.mrf.mxu1  ;;  %v3838_v15 = vmul.f32 %v3740_v57, %v1271_v51  ;;  %v3841_v16 = vmul.f32 %v3740_v57, %v1303_v38  ;;  %v1296_v53 = vmax.f32 %v3861_v29, 0.0 }
 0x216   : > { %v1273_v17 = vmax.f32 %v1039_v4, 0.0  ;;  %v1305_v58 = vmax.f32 %v1199_v31, 0.0  ;;  %v1034_v19 = vadd.f32 %v3732_v40, %v1033_v5  ;;  %v1194_v21 = vadd.f32 %v3732_v40, %v1193_v7  ;;  %1403 = vadd.xlane.f32.xlu0 %v1331_v41 }
 0x217   : > { %v2738_v22 = vpop.f32.mrf.mxu0  ;;  %v2786_v23 = vpop.f32.mrf.mxu1  ;;  %v3848_v24 = vmul.f32 %v3740_v57, %v1270_v1  ;;  %v3851_v8 = vmul.f32 %v3740_v57, %v1302_v2  ;;  %v1009_v4 = vadd.f32 %v3778_v62, %v3732_v40  ;;  %v3895_v31 = vadd.f32 %v3780_v63, %v3732_v40 }
 0x218   : > { %v1272_v25 = vmax.f32 %v1034_v19, 0.0  ;;  %v1304_v26 = vmax.f32 %v1194_v21, 0.0  ;;  %v1049_v27 = vadd.f32 %v2738_v22, %v3732_v40  ;;  %v1209_v9 = vadd.f32 %v2786_v23, %v3732_v40  ;;  %1409 = vadd.xlane.f32.xlu1 %v1334_v48 }
 0x219   : > { %v1043_v30 = vpop.f32.mrf.mxu0  ;;  %v1203_v10 = vpop.f32.mrf.mxu1  ;;  %v3864_v33 = vmul.f32 %v3740_v57, %v1273_v17  ;;  %v3867_v35 = vmul.f32 %v3740_v57, %v1305_v58  ;;  %v1336_v63 = vmul.f32 %v3740_v57, %v1265_v54  ;;  %v1368_v23 = vmul.f32 %v3740_v57, %v1297_v18 }
 0x21a   : > { %v1275_v39 = vmax.f32 %v1049_v27, 0.0  ;;  %v1307_v13 = vmax.f32 %v1209_v9, 0.0  ;;  %v1044_v41 = vadd.f32 %v3732_v40, %v1043_v30  ;;  %v1204_v56 = vadd.f32 %v3732_v40, %v1203_v10  ;;  %1467 = vadd.xlane.f32.xlu0 %v1363_v42 }
 0x21b   : > { %v2741_v43 = vpop.f32.mrf.mxu0  ;;  %v2789_v14 = vpop.f32.mrf.mxu1  ;;  %v3874_v36 = vmul.f32 %v3740_v57, %v1272_v25  ;;  %v3877_v45 = vmul.f32 %v3740_v57, %v1304_v26  ;;  %v1264_v42 = vmax.f32 %v3857_v28, 0.0  ;;  %v1267_v10 = vmax.f32 %v1009_v4, 0.0 }
 0x21c   : > { %v1274_v46 = vmax.f32 %v1044_v41, 0.0  ;;  %v1306_v51 = vmax.f32 %v1204_v56, 0.0  ;;  %v1059_v38 = vadd.f32 %v2741_v43, %v3732_v40  ;;  %v1219_v52 = vadd.f32 %v2789_v14, %v3732_v40  ;;  %1473 = vadd.xlane.f32.xlu1 %v1366_v12 }
 0x21d   : > { %v1053_v37 = vpop.f32.mrf.mxu0  ;;  %v1213_v55 = vpop.f32.mrf.mxu1  ;;  %v3884_v20 = vmul.f32 %v3740_v57, %v1275_v39  ;;  %v3887_v3 = vmul.f32 %v3740_v57, %v1307_v13  ;;  %v1004_v39 = vadd.f32 %v3732_v40, %v3783_v50  ;;  %v1338_v4 = vmul.f32 %v3740_v57, %v1267_v10 }
 0x21e   : > { %v1277_v11 = vmax.f32 %v1059_v38, 0.0  ;;  %v1309_v60 = vmax.f32 %v1219_v52, 0.0  ;;  %v1054_v1 = vadd.f32 %v3732_v40, %v1053_v37  ;;  %v1214_v2 = vadd.f32 %v3732_v40, %v1213_v55  ;;  %1407 = vadd.xlane.f32.xlu0 %v1333_v59 }
 0x21f   : > { %v2744_v5 = vpop.f32.mrf.mxu0  ;;  %v2792_v7 = vpop.f32.mrf.mxu1  ;;  %v3898_v48 = vmul.f32 %v3740_v57, %v1274_v46  ;;  %v3901_v12 = vmul.f32 %v3740_v57, %v1306_v51  ;;  %v1335_v51 = vmul.f32 %v3740_v57, %v1264_v42 }
 0x220   : > { %v1276_v17 = vmax.f32 %v1054_v1, 0.0  ;;  %v1308_v58 = vmax.f32 %v1214_v2, 0.0  ;;  %v1069_v19 = vadd.f32 %v2744_v5, %v3732_v40  ;;  %v1229_v21 = vadd.f32 %v2792_v7, %v3732_v40  ;;  %1471 = vadd.xlane.f32.xlu1 %v1365_v44 }
 0x221   : > { %v1063_v62 = vpop.f32.mrf.mxu0  ;;  %v1223_v22 = vpop.f32.mrf.mxu1  ;;  %v3908_v25 = vmul.f32 %v3740_v57, %v1277_v11  ;;  %v3911_v26 = vmul.f32 %v3740_v57, %v1309_v60  ;;  %v1164_v44 = vadd.f32 %v3732_v40, %v3785_v6  ;;  %v1266_v1 = vmax.f32 %v1004_v39, 0.0 }
 0x222   : > { %v1279_v27 = vmax.f32 %v1069_v19, 0.0  ;;  %v1311_v9 = vmax.f32 %v1229_v21, 0.0  ;;  %v1064_v28 = vadd.f32 %v3732_v40, %v1063_v62  ;;  %v1224_v30 = vadd.f32 %v3732_v40, %v1223_v22  ;;  %1413 = vadd.xlane.f32.xlu0 %v1336_v63 }
 0x223   : > { %v2747_v54 = vpop.f32.mrf.mxu0  ;;  %v2795_v13 = vpop.f32.mrf.mxu1  ;;  %v3918_v18 = vmul.f32 %v3740_v57, %v1276_v17  ;;  %v3921_v41 = vmul.f32 %v3740_v57, %v1308_v58  ;;  %v1299_v21 = vmax.f32 %v3895_v31, 0.0  ;;  %v1367_v63 = vmul.f32 %v3740_v57, %v1296_v53 }
 0x224   : > { %v1278_v56 = vmax.f32 %v1064_v28, 0.0  ;;  %v1310_v43 = vmax.f32 %v1224_v30, 0.0  ;;  %v1079_v14 = vadd.f32 %v2747_v54, %v3732_v40  ;;  %v1239_v59 = vadd.f32 %v2795_v13, %v3732_v40  ;;  %1477 = vadd.xlane.f32.xlu1 %v1368_v23 }
 0x225   : > { %v1073_v50 = vpop.f32.mrf.mxu0  ;;  %v1233_v46 = vpop.f32.mrf.mxu1  ;;  %v3929_v38 = vmul.f32 %v3740_v57, %v1279_v27  ;;  %v3932_v52 = vmul.f32 %v3740_v57, %v1311_v9  ;;  %v1298_v39 = vmax.f32 %v1164_v44, 0.0  ;;  %v1337_v31 = vmul.f32 %v3740_v57, %v1266_v1 }
 0x226   : > { %v1281_v37 = vmax.f32 %v1079_v14, 0.0  ;;  %v1313_v55 = vmax.f32 %v1239_v59, 0.0  ;;  %v1074_v11 = vadd.f32 %v3732_v40, %v1073_v50  ;;  %v1234_v60 = vadd.f32 %v3732_v40, %v1233_v46  ;;  %1411 = vadd.xlane.f32.xlu0 %v1335_v51 }
 0x227   : > { %v2750_v6 = vpop.f32.mrf.mxu0  ;;  %v2798_v2 = vpop.f32.mrf.mxu1  ;;  %v1349_v42 = vmul.f32 %v3740_v57, %v1278_v56  ;;  %v1381_v5 = vmul.f32 %v3740_v57, %v1310_v43  ;;  %v1370_v14 = vmul.f32 %v3740_v57, %v1299_v21  ;;  %v1369_v44 = vmul.f32 %v3740_v57, %v1298_v39 }
 0x228   : > { %v1280_v7 = vmax.f32 %v1074_v11, 0.0  ;;  %v1312_v17 = vmax.f32 %v1234_v60, 0.0  ;;  %v1089_v58 = vadd.f32 %v2750_v6, %v3732_v40  ;;  %v1249_v19 = vadd.f32 %v2798_v2, %v3732_v40  ;;  %1417 = vadd.xlane.f32.xlu1 %v1338_v4 }
 0x229   : > { %v1083_v62 = vpop.f32.mrf.mxu0  ;;  %v1243_v22 = vpop.f32.mrf.mxu1  ;;  %v1352_v23 = vmul.f32 %v3740_v57, %v1281_v37  ;;  %v1384_v27 = vmul.f32 %v3740_v57, %v1313_v55 }
 0x22a   : > { %v1283_v9 = vmax.f32 %v1089_v58, 0.0  ;;  %v1315_v28 = vmax.f32 %v1249_v19, 0.0  ;;  %v1084_v30 = vadd.f32 %v3732_v40, %v1083_v62  ;;  %v1244_v10 = vadd.f32 %v3732_v40, %v1243_v22  ;;  %1475 = vadd.xlane.f32.xlu0 %v1367_v63 }
 0x22b   : > { %v1351_v54 = vmul.f32 %v3740_v57, %v1280_v7  ;;  %v1383_v29 = vmul.f32 %v3740_v57, %v1312_v17 }
 0x22c   : > { %v1282_v13 = vmax.f32 %v1084_v30, 0.0  ;;  %v1314_v53 = vmax.f32 %v1244_v10, 0.0  ;;  %v1354_v56 = vmul.f32 %v3740_v57, %v1283_v9  ;;  %v1386_v43 = vmul.f32 %v3740_v57, %v1315_v28  ;;  %1415 = vadd.xlane.f32.xlu1 %v1337_v31 }
 0x22e   : > { %v1353_v59 = vmul.f32 %v3740_v57, %v1282_v13  ;;  %v1385_v40 = vmul.f32 %v3740_v57, %v1314_v53  ;;  %1481 = vadd.xlane.f32.xlu0 %v1370_v14  ;;  %v3980_v57 = vstv %s1515_s15 }
 0x230   : > { %1479 = vadd.xlane.f32.xlu1 %v1369_v44 }
 0x232   : > { %1421 = vadd.xlane.f32.xlu0 %v3812_v47 }
 0x234   : > { %1485 = vadd.xlane.f32.xlu1 %v3815_v49 }
 0x236   : > { %1483 = vadd.xlane.f32.xlu0 %v3828_v61 }
 0x238   : > { %1419 = vadd.xlane.f32.xlu1 %v3831_v0 }
 0x23a   : > { %1423 = vadd.xlane.f32.xlu0 %v3848_v24 }
 0x23c   : > { %1425 = vadd.xlane.f32.xlu1 %v3838_v15 }
 0x23e   : > { %1487 = vadd.xlane.f32.xlu0 %v3851_v8 }
 0x240   : > { %1489 = vadd.xlane.f32.xlu1 %v3841_v16 }
 0x242   : > { %1429 = vadd.xlane.f32.xlu0 %v3864_v33 }
 0x244   : > { %1427 = vadd.xlane.f32.xlu1 %v3874_v36 }
 0x246   : > { %1493 = vadd.xlane.f32.xlu0 %v3867_v35 }
 0x248   : > { %1433 = vadd.xlane.f32.xlu1 %v3884_v20 }
 0x24a   : > { %1491 = vadd.xlane.f32.xlu0 %v3877_v45 }
 0x24c   : > { %1497 = vadd.xlane.f32.xlu1 %v3887_v3 }
 0x24e   : > { %1431 = vadd.xlane.f32.xlu0 %v3898_v48 }
 0x250   : > { %1495 = vadd.xlane.f32.xlu1 %v3901_v12 }
 0x252   : > { %1437 = vadd.xlane.f32.xlu0 %v3908_v25 }
 0x254   : > { %1435 = vadd.xlane.f32.xlu1 %v3918_v18 }
 0x256   : > { %1501 = vadd.xlane.f32.xlu0 %v3911_v26 }
 0x258   : > { %1499 = vadd.xlane.f32.xlu1 %v3921_v41 }
 0x25a   : > { %1441 = vadd.xlane.f32.xlu0 %v3929_v38 }
 0x25c   : > { %1505 = vadd.xlane.f32.xlu1 %v3932_v52 }
 0x25e   : > { %1439 = vadd.xlane.f32.xlu0 %v1349_v42 }
 0x260   : > { %1445 = vadd.xlane.f32.xlu1 %v1352_v23 }
 0x262   : > { %1503 = vadd.xlane.f32.xlu0 %v1381_v5 }
 0x264   : > { %1443 = vadd.xlane.f32.xlu1 %v1351_v54 }
 0x266   : > { %1509 = vadd.xlane.f32.xlu0 %v1384_v27 }
 0x268   : > { %1507 = vadd.xlane.f32.xlu1 %v1383_v29  ;;  %v3997_v29 = vand.u32 127, %v514_v32 }
 0x26a   : > { %1447 = vadd.xlane.f32.xlu0 %v1353_v59 }
 0x26c   : > { %1449 = vadd.xlane.f32.xlu1 %v1354_v56 }
 0x26e   : > { %1511 = vadd.xlane.f32.xlu0 %v1385_v40 }
 0x270   : > { %1513 = vadd.xlane.f32.xlu1 %v1386_v43 }
 0x27b   : > { %v1390_v47 = vpop.xlane.xlu0 %1389 }
 0x27c   : > { %v1518_v49 = vadd.f32 %v3980_v57, %v1390_v47 }
 0x27d   : > { %v1452_v61 = vpop.xlane.xlu1 %1451 }
 0x27e   : > { %v2508_v0 = vmul.f32 -1.442695, %v1518_v49  ;;  %v1549_v15 = vadd.f32 %v3980_v57, %v1452_v61  ;;  %v2035_v61 = vadd.s32 4294967288, %v3997_v29 }
 0x27f   : > { %v1454_v16 = vpop.xlane.xlu0 %1453 }
 0x280   : > { %2921 = vpow2.f32 %v2508_v0  ;;  %v2539_v24 = vmul.f32 -1.442695, %v1549_v15  ;;  %v1550_v8 = vadd.f32 %v3980_v57, %v1454_v16 }
 0x281   : > { %v1394_v33 = vpop.xlane.xlu1 %1393 }
 0x282   : > { %2923 = vpow2.f32 %v2539_v24  ;;  %v2540_v35 = vmul.f32 -1.442695, %v1550_v8  ;;  %v1520_v36 = vadd.f32 %v3980_v57, %v1394_v33  ;;  %v4005_v8 = vsub.s32 %v3997_v29, %v3534_v34 }
 0x283   : > { %v1388_v45 = vpop.xlane.xlu0 %1387 }
 0x284   : > { %2925 = vpow2.f32 %v2540_v35  ;;  %v2510_v20 = vmul.f32 -1.442695, %v1520_v36  ;;  %v1517_v3 = vadd.f32 %v3980_v57, %v1388_v45 }
 0x285   : > { %v1392_v48 = vpop.xlane.xlu1 %1391 }
 0x286   : > { %2927 = vpow2.f32 %v2510_v20  ;;  %v2507_v12 = vmul.f32 -1.442695, %v1517_v3  ;;  %v1519_v25 = vadd.f32 %v3980_v57, %v1392_v48  ;;  %v4009_v3 = vsub.s32 %v2035_v61, %v3534_v34 }
 0x287   : > { %v1458_v26 = vpop.xlane.xlu0 %1457  ;;  %v2049_v48 = vadd.s32 4294967272, %v3997_v29 }
 0x288   : > { %2929 = vpow2.f32 %v2507_v12  ;;  %v2509_v18 = vmul.f32 -1.442695, %v1519_v25  ;;  %v1552_v41 = vadd.f32 %v3980_v57, %v1458_v26 }
 0x289   : > { %v1456_v50 = vpop.xlane.xlu1 %1455 }
 0x28a   : > { %2931 = vpow2.f32 %v2509_v18  ;;  %v2542_v46 = vmul.f32 -1.442695, %v1552_v41  ;;  %v1551_v51 = vadd.f32 %v3980_v57, %v1456_v50  ;;  %v2042_v18 = vadd.s32 4294967280, %v3997_v29 }
 0x28b   : > { %v1460_v38 = vpop.xlane.xlu0 %1459 }
 0x28c   : > { %2933 = vpow2.f32 %v2542_v46  ;;  %v2541_v52 = vmul.f32 -1.442695, %v1551_v51  ;;  %v1553_v37 = vadd.f32 %v3980_v57, %v1460_v38 }
 0x28d   : > { %v2922_v55 = vpop.eup %2921  ;;  %v1398_v11 = vpop.xlane.xlu1 %1397 }
 0x28e   : > { %v1774_v60 = vadd.f32 1.0, %v2922_v55  ;;  %2935 = vpow2.f32 %v2541_v52  ;;  %v2543_v1 = vmul.f32 -1.442695, %v1553_v37  ;;  %v1522_v6 = vadd.f32 %v3980_v57, %v1398_v11 }
 0x28f   : > { %v2924_v2 = vpop.eup %2923  ;;  %v1402_v4 = vpop.xlane.xlu0 %1401 }
 0x290   : > { %2937 = vrcp.f32 %v1774_v60  ;;  %v1805_v42 = vadd.f32 1.0, %v2924_v2  ;;  %v2512_v5 = vmul.f32 -1.442695, %v1522_v6  ;;  %v1524_v7 = vadd.f32 %v3980_v57, %v1402_v4 }
 0x291   : > { %v2926_v17 = vpop.eup %2925  ;;  %2939 = vpow2.f32 %v2543_v1  ;;  %v1462_v58 = vpop.xlane.xlu1 %1461  ;;  %v4018_v6 = vsub.s32 %v2049_v48, %v3534_v34 }
 0x292   : > { %2941 = vrcp.f32 %v1805_v42  ;;  %v1806_v19 = vadd.f32 1.0, %v2926_v17  ;;  %v2514_v21 = vmul.f32 -1.442695, %v1524_v7  ;;  %v1554_v62 = vadd.f32 %v3980_v57, %v1462_v58 }
 0x293   : > { %v2928_v22 = vpop.eup %2927  ;;  %2943 = vpow2.f32 %v2512_v5  ;;  %v1466_v63 = vpop.xlane.xlu0 %1465  ;;  %v4022_v7 = vsub.s32 %v2042_v18, %v3534_v34 }
 0x294   : > { %2945 = vrcp.f32 %v1806_v19  ;;  %v1776_v23 = vadd.f32 1.0, %v2928_v22  ;;  %v2544_v27 = vmul.f32 -1.442695, %v1554_v62  ;;  %v1556_v9 = vadd.f32 %v3980_v57, %v1466_v63 }
 0x295   : > { %v2930_v28 = vpop.eup %2929  ;;  %2947 = vpow2.f32 %v2514_v21  ;;  %v1396_v30 = vpop.xlane.xlu1 %1395  ;;  %v2056_v19 = vadd.s32 4294967264, %v3997_v29 }
 0x296   : > { %2949 = vrcp.f32 %v1776_v23  ;;  %v1773_v10 = vadd.f32 1.0, %v2930_v28  ;;  %v2546_v39 = vmul.f32 -1.442695, %v1556_v9  ;;  %v1521_v31 = vadd.f32 %v3980_v57, %v1396_v30 }
 0x297   : > { %v2932_v54 = vpop.eup %2931  ;;  %2951 = vpow2.f32 %v2544_v27  ;;  %v1400_v13 = vpop.xlane.xlu0 %1399 }
 0x298   : > { %2953 = vrcp.f32 %v1773_v10  ;;  %v1775_v53 = vadd.f32 1.0, %v2932_v54  ;;  %v2511_v56 = vmul.f32 -1.442695, %v1521_v31  ;;  %v1523_v43 = vadd.f32 %v3980_v57, %v1400_v13 }
 0x299   : > { %v2934_v14 = vpop.eup %2933  ;;  %2955 = vpow2.f32 %v2546_v39  ;;  %v1406_v59 = vpop.xlane.xlu1 %1405 }
 0x29a   : > { %2957 = vrcp.f32 %v1775_v53  ;;  %v1808_v40 = vadd.f32 1.0, %v2934_v14  ;;  %v2513_v44 = vmul.f32 -1.442695, %v1523_v43  ;;  %v1526_v47 = vadd.f32 %v3980_v57, %v1406_v59 }
 0x29b   : > { %v2936_v49 = vpop.eup %2935  ;;  %2959 = vpow2.f32 %v2511_v56  ;;  %v1464_v32 = vpop.xlane.xlu0 %1463 }
 0x29c   : > { %2961 = vrcp.f32 %v1808_v40  ;;  %v1807_v0 = vadd.f32 1.0, %v2936_v49  ;;  %v2516_v15 = vmul.f32 -1.442695, %v1526_v47  ;;  %v1555_v16 = vadd.f32 %v3980_v57, %v1464_v32 }
 0x29d   : > { %v2938_v24 = vpop.eup %2937  ;;  %2963 = vpow2.f32 %v2513_v44  ;;  %v1470_v33 = vpop.xlane.xlu1 %1469  ;;  %v4035_v49 = vsub.s32 %v2056_v19, %v3534_v34 }
 0x29e   : > { %v2940_v35 = vpop.eup %2939  ;;  %2965 = vrcp.f32 %v1807_v0  ;;  %v2545_v36 = vmul.f32 -1.442695, %v1555_v16  ;;  %v1558_v45 = vadd.f32 %v3980_v57, %v1470_v33  ;;  %v2039_v23 = vrot.slane %v2938_v24, %v4009_v3 }
 0x29f   : > { %v2942_v20 = vpop.eup %2941  ;;  %v1809_v12 = vadd.f32 1.0, %v2940_v35  ;;  %2967 = vpow2.f32 %v2516_v15  ;;  %v1404_v25 = vpop.xlane.xlu0 %1403 }
 0x2a0   : > { %v2944_v26 = vpop.eup %2943  ;;  %2969 = vpow2.f32 %v2545_v36  ;;  %v2548_v41 = vmul.f32 -1.442695, %v1558_v45  ;;  %v1525_v50 = vadd.f32 %v3980_v57, %v1404_v25  ;;  %v2204_v51 = vrot.slane %v2942_v20, %v4005_v8 }
 0x2a1   : > { %v2946_v46 = vpop.eup %2945  ;;  %2971 = vrcp.f32 %v1809_v12  ;;  %v1778_v38 = vadd.f32 1.0, %v2944_v26  ;;  %v1410_v52 = vpop.xlane.xlu1 %1409  ;;  %v2063_v36 = vadd.s32 4294967256, %v3997_v29 }
 0x2a2   : > { %v2948_v37 = vpop.eup %2947  ;;  %v2208_v55 = vrot.slane %v2946_v46, %v4009_v3  ;;  %2973 = vpow2.f32 %v2548_v41  ;;  %v2515_v11 = vmul.f32 -1.442695, %v1525_v50  ;;  %v1528_v60 = vadd.f32 %v3980_v57, %v1410_v52 }
 0x2a3   : > { %v2950_v1 = vpop.eup %2949  ;;  %2975 = vrcp.f32 %v1778_v38  ;;  %v1780_v2 = vadd.f32 1.0, %v2948_v37  ;;  %v1468_v4 = vpop.xlane.xlu0 %1467 }
 0x2a4   : > { %v2952_v42 = vpop.eup %2951  ;;  %v2209_v5 = vsel %vm2040_vm2, %v2208_v55, %v2204_v51  ;;  %2977 = vpow2.f32 %v2515_v11  ;;  %v2518_v17 = vmul.f32 -1.442695, %v1528_v60  ;;  %v1557_v62 = vadd.f32 %v3980_v57, %v1468_v4 }
 0x2a5   : > { %v2954_v58 = vpop.eup %2953  ;;  %2979 = vrcp.f32 %v1780_v2  ;;  %v1810_v21 = vadd.f32 1.0, %v2952_v42  ;;  %v1474_v22 = vpop.xlane.xlu1 %1473  ;;  %v2053_v14 = vrot.slane %v2950_v1, %v4018_v6  ;;  %v2077_v4 = vadd.s32 4294967240, %v3997_v29 }
 0x2a6   : > { %v2956_v63 = vpop.eup %2955  ;;  %v2034_v27 = vrot.slane %v2954_v58, %v4005_v8  ;;  %2981 = vpow2.f32 %v2518_v17  ;;  %v1560_v9 = vadd.f32 %v3980_v57, %v1474_v22  ;;  %v2547_v10 = vmul.f32 -1.442695, %v1557_v62 }
 0x2a7   : > { %v2958_v28 = vpop.eup %2957  ;;  %2983 = vrcp.f32 %v1810_v21  ;;  %v1812_v30 = vadd.f32 1.0, %v2956_v63  ;;  %v1408_v39 = vpop.xlane.xlu0 %1407  ;;  %v4058_v22 = vsub.s32 %v2063_v36, %v3534_v34  ;;  %v2070_v63 = vadd.s32 4294967248, %v3997_v29 }
 0x2a8   : > { %v2960_v31 = vpop.eup %2959  ;;  %v2041_v54 = vsel %vm2040_vm2, %v2039_v23, %v2034_v27  ;;  %v2046_v13 = vrot.slane %v2958_v28, %v4022_v7  ;;  %v2550_v53 = vmul.f32 -1.442695, %v1560_v9  ;;  %v1527_v56 = vadd.f32 %v3980_v57, %v1408_v39 }
 0x2a9   : > { %v2962_v43 = vpop.eup %2961  ;;  %2985 = vrcp.f32 %v1812_v30  ;;  %v1777_v59 = vadd.f32 1.0, %v2960_v31  ;;  %v1472_v40 = vpop.xlane.xlu1 %1471 }
 0x2aa   : > { %v2964_v44 = vpop.eup %2963  ;;  %v2048_v47 = vsel %vm2047_vm3, %v2046_v13, %v2041_v54  ;;  %2987 = vpow2.f32 %v2547_v10  ;;  %v2517_v61 = vmul.f32 -1.442695, %v1527_v56  ;;  %v1559_v16 = vadd.f32 %v3980_v57, %v1472_v40 }
 0x2ab   : > { %v2966_v32 = vpop.eup %2965  ;;  %v4038_v0 = vsel %vm2054_vm4, %v2053_v14, %v2048_v47  ;;  %2989 = vrcp.f32 %v1777_v59  ;;  %v1779_v15 = vadd.f32 1.0, %v2964_v44  ;;  %v1414_v24 = vpop.xlane.xlu0 %1413  ;;  %v2218_v48 = vrot.slane %v2962_v43, %v4018_v6 }
 0x2ac   : > { %v2968_v33 = vpop.eup %2967  ;;  %v2213_v35 = vrot.slane %v2966_v32, %v4022_v7  ;;  %2991 = vpow2.f32 %v2550_v53  ;;  %v1530_v45 = vadd.f32 %v3980_v57, %v1414_v24  ;;  %v2549_v25 = vmul.f32 -1.442695, %v1559_v16 }
 0x2ad   : > { %v2970_v20 = vpop.eup %2969  ;;  %2993 = vrcp.f32 %v1779_v15  ;;  %v1782_v12 = vadd.f32 1.0, %v2968_v33  ;;  %v1478_v26 = vpop.xlane.xlu1 %1477  ;;  %v4063_v10 = vsub.s32 %v2077_v4, %v3534_v34  ;;  %v4070_v56 = vsub.s32 %v2070_v63, %v3534_v34 }
 0x2ae   : > { %v2972_v18 = vpop.eup %2971  ;;  %v2214_v41 = vsel %vm2047_vm3, %v2213_v35, %v2209_v5  ;;  %v1811_v50 = vadd.f32 1.0, %v2970_v20  ;;  %2995 = vpow2.f32 %v2517_v61  ;;  %v2520_v46 = vmul.f32 -1.442695, %v1530_v45 }
 0x2af   : > { %v2974_v51 = vpop.eup %2973  ;;  %v2219_v38 = vsel %vm2054_vm4, %v2218_v48, %v2214_v41  ;;  %v2223_v52 = vrot.slane %v2972_v18, %v4035_v49  ;;  %2997 = vrcp.f32 %v1782_v12  ;;  %v1562_v37 = vadd.f32 %v3980_v57, %v1478_v26  ;;  %v1412_v55 = vpop.xlane.xlu0 %1411 }
 0x2b0   : > { %v4049_v11 = vpop.eup %2975  ;;  %2999 = vrcp.f32 %v1811_v50  ;;  %v1529_v60 = vadd.f32 %v3980_v57, %v1412_v55  ;;  %v1814_v58 = vadd.f32 1.0, %v2974_v51 }
 0x2b1   : > { %v2978_v1 = vpop.eup %2977  ;;  %v2224_v2 = vsel %vm2061_vm5, %v2223_v52, %v2219_v38  ;;  %3001 = vpow2.f32 %v2549_v25  ;;  %v2552_v42 = vmul.f32 -1.442695, %v1562_v37  ;;  %v1418_v5 = vpop.xlane.xlu1 %1417  ;;  %v2067_v15 = vrot.slane %v4049_v11, %v4058_v22 }
 0x2b2   : > { %v4054_v17 = vpop.eup %2979  ;;  %v1781_v19 = vadd.f32 1.0, %v2978_v1  ;;  %v1532_v21 = vadd.f32 %v3980_v57, %v1418_v5  ;;  %3003 = vpow2.f32 %v2520_v46  ;;  %v2519_v23 = vmul.f32 -1.442695, %v1529_v60 }
 0x2b3   : > { %v2982_v62 = vpop.eup %2981  ;;  %v1476_v27 = vpop.xlane.xlu0 %1475  ;;  %v2081_v33 = vrot.slane %v4054_v17, %v4063_v10 }
 0x2b4   : > { %v2984_v9 = vpop.eup %2983  ;;  %3005 = vrcp.f32 %v1781_v19  ;;  %v2522_v28 = vmul.f32 -1.442695, %v1532_v21  ;;  %v1561_v30 = vadd.f32 %v3980_v57, %v1476_v27  ;;  %v1784_v43 = vadd.f32 1.0, %v2982_v62 }
 0x2b5   : > { %v2228_v39 = vrot.slane %v2984_v9, %v4058_v22  ;;  %3007 = vpow2.f32 %v2552_v42  ;;  %v1416_v31 = vpop.xlane.xlu1 %1415 }
 0x2b6   : > { %v4066_v54 = vpop.eup %2985  ;;  %3009 = vrcp.f32 %v1814_v58  ;;  %v2551_v29 = vmul.f32 -1.442695, %v1561_v30  ;;  %v1531_v13 = vadd.f32 %v3980_v57, %v1416_v31 }
 0x2b7   : > { %v2988_v53 = vpop.eup %2987  ;;  %3011 = vpow2.f32 %v2519_v23  ;;  %v1482_v14 = vpop.xlane.xlu0 %1481  ;;  %v2229_v59 = vsel %vm2068_vm6, %v2228_v39, %v2224_v2  ;;  %v2238_v60 = vrot.slane %v4066_v54, %v4063_v10 }
 0x2b8   : > { %v2990_v40 = vpop.eup %2989  ;;  %v1813_v44 = vadd.f32 1.0, %v2988_v53  ;;  %3013 = vpow2.f32 %v2522_v28  ;;  %v2521_v47 = vmul.f32 -1.442695, %v1531_v13  ;;  %v1564_v61 = vadd.f32 %v3980_v57, %v1482_v14 }
 0x2b9   : > { %v2992_v32 = vpop.eup %2991  ;;  %v2060_v16 = vrot.slane %v2990_v40, %v4035_v49  ;;  %3015 = vpow2.f32 %v2551_v29  ;;  %v1480_v34 = vpop.xlane.xlu1 %1479 }
 0x2ba   : > { %v2994_v24 = vpop.eup %2993  ;;  %3017 = vrcp.f32 %v1813_v44  ;;  %v1816_v35 = vadd.f32 1.0, %v2992_v32  ;;  %v1563_v36 = vadd.f32 %v3980_v57, %v1480_v34  ;;  %v2554_v12 = vmul.f32 -1.442695, %v1564_v61 }
 0x2bb   : > { %v2996_v45 = vpop.eup %2995  ;;  %v2062_v20 = vsel %vm2061_vm5, %v2060_v16, %v4038_v0  ;;  %v2074_v48 = vrot.slane %v2994_v24, %v4070_v56  ;;  %3019 = vpow2.f32 %v2521_v47  ;;  %v1422_v25 = vpop.xlane.xlu0 %1421 }
 0x2bc   : > { %v2998_v26 = vpop.eup %2997  ;;  %v2069_v18 = vsel %vm2068_vm6, %v2067_v15, %v2062_v20  ;;  %3021 = vrcp.f32 %v1784_v43  ;;  %v1783_v41 = vadd.f32 1.0, %v2996_v45  ;;  %v2553_v50 = vmul.f32 -1.442695, %v1563_v36 }
 0x2bd   : > { %v3000_v46 = vpop.eup %2999  ;;  %v2076_v51 = vsel %vm2075_vm7, %v2074_v48, %v2069_v18  ;;  %3023 = vrcp.f32 %v1816_v35  ;;  %v1534_v38 = vadd.f32 %v3980_v57, %v1422_v25  ;;  %v1486_v52 = vpop.xlane.xlu1 %1485  ;;  %v2091_v21 = vrot.slane %v2998_v26, %v4009_v3 }
 0x2be   : > { %v3002_v37 = vpop.eup %3001  ;;  %v2233_v0 = vrot.slane %v3000_v46, %v4070_v56  ;;  %3025 = vrcp.f32 %v1783_v41  ;;  %v1566_v55 = vadd.f32 %v3980_v57, %v1486_v52  ;;  %v4089_v11 = vsel %vm2082_vm8, %v2081_v33, %v2076_v51 }
 0x2bf   : > { %v1815_v1 = vadd.f32 1.0, %v3002_v37  ;;  %3027 = vpow2.f32 %v2554_v12  ;;  %v2524_v2 = vmul.f32 -1.442695, %v1534_v38  ;;  %v1484_v4 = vpop.xlane.xlu0 %1483  ;;  %v3004_v42 = vpop.eup %3003 }
 0x2c0   : > { %3029 = vpow2.f32 %v2553_v50  ;;  %v2556_v5 = vmul.f32 -1.442695, %v1566_v55  ;;  %v1565_v17 = vadd.f32 %v3980_v57, %v1484_v4  ;;  %v2234_v58 = vsel %vm2075_vm7, %v2233_v0, %v2229_v59 }
 0x2c1   : > { %v3006_v19 = vpop.eup %3005  ;;  %3031 = vrcp.f32 %v1815_v1  ;;  %v1786_v62 = vadd.f32 1.0, %v3004_v42  ;;  %v1420_v63 = vpop.xlane.xlu1 %1419  ;;  %v4097_v23 = vsel %vm2082_vm8, %v2238_v60, %v2234_v58 }
 0x2c2   : > { %v3008_v27 = vpop.eup %3007  ;;  %v2087_v9 = vrot.slane %v3006_v19, %v4005_v8  ;;  %3033 = vpow2.f32 %v2524_v2  ;;  %v2555_v28 = vmul.f32 -1.442695, %v1565_v17  ;;  %v1533_v30 = vadd.f32 %v3980_v57, %v1420_v63 }
 0x2c3   : > { %v3010_v39 = vpop.eup %3009  ;;  %3035 = vrcp.f32 %v1786_v62  ;;  %v1818_v31 = vadd.f32 1.0, %v3008_v27  ;;  %v1424_v54 = vpop.xlane.xlu0 %1423 }
 0x2c4   : > { %v3012_v29 = vpop.eup %3011  ;;  %v2092_v13 = vsel %vm2040_vm2, %v2091_v21, %v2087_v9  ;;  %3037 = vpow2.f32 %v2556_v5  ;;  %v1535_v14 = vadd.f32 %v3980_v57, %v1424_v54  ;;  %v2523_v47 = vmul.f32 -1.442695, %v1533_v30 }
 0x2c5   : > { %v3014_v53 = vpop.eup %3013  ;;  %3039 = vrcp.f32 %v1818_v31  ;;  %v1785_v43 = vadd.f32 1.0, %v3012_v29  ;;  %v1426_v59 = vpop.xlane.xlu1 %1425  ;;  %v2247_v24 = vrot.slane %v3010_v39, %v4009_v3 }
 0x2c6   : > { %v3016_v40 = vpop.eup %3015  ;;  %v1788_v44 = vadd.f32 1.0, %v3014_v53  ;;  %3041 = vpow2.f32 %v2555_v28  ;;  %v1536_v15 = vadd.f32 %v3980_v57, %v1426_v59  ;;  %v2525_v45 = vmul.f32 -1.442695, %v1535_v14 }
 0x2c7   : > { %v3018_v61 = vpop.eup %3017  ;;  %3043 = vrcp.f32 %v1785_v43  ;;  %v1817_v32 = vadd.f32 1.0, %v3016_v40  ;;  %v1488_v16 = vpop.xlane.xlu0 %1487 }
 0x2c8   : > { %v3020_v34 = vpop.eup %3019  ;;  %v2243_v33 = vrot.slane %v3018_v61, %v4005_v8  ;;  %3045 = vrcp.f32 %v1788_v44  ;;  %v1567_v20 = vadd.f32 %v3980_v57, %v1488_v16  ;;  %v2526_v18 = vmul.f32 -1.442695, %v1536_v15 }
 0x2c9   : > { %v3022_v35 = vpop.eup %3021  ;;  %3047 = vrcp.f32 %v1817_v32  ;;  %v1787_v36 = vadd.f32 1.0, %v3020_v34  ;;  %v1490_v48 = vpop.xlane.xlu1 %1489 }
 0x2ca   : > { %v3024_v12 = vpop.eup %3023  ;;  %v2248_v25 = vsel %vm2040_vm2, %v2247_v24, %v2243_v33  ;;  %3049 = vpow2.f32 %v2523_v47  ;;  %v1568_v41 = vadd.f32 %v3980_v57, %v1490_v48  ;;  %v2101_v52 = vrot.slane %v3022_v35, %v4018_v6 }
 0x2cb   : > { %v3026_v26 = vpop.eup %3025  ;;  %3051 = vrcp.f32 %v1787_v36  ;;  %v1430_v50 = vpop.xlane.xlu0 %1429  ;;  %v2557_v37 = vmul.f32 -1.442695, %v1567_v20  ;;  %v2257_v21 = vrot.slane %v3024_v12, %v4018_v6 }
 0x2cc   : > { %v3028_v46 = vpop.eup %3027  ;;  %v2096_v51 = vrot.slane %v3026_v26, %v4022_v7  ;;  %3053 = vpow2.f32 %v2525_v45  ;;  %v1538_v0 = vadd.f32 %v3980_v57, %v1430_v50  ;;  %v2558_v2 = vmul.f32 -1.442695, %v1568_v41 }
 0x2cd   : > { %v3030_v38 = vpop.eup %3029  ;;  %v1428_v55 = vpop.xlane.xlu1 %1427  ;;  %3055 = vpow2.f32 %v2526_v18  ;;  %v1820_v62 = vadd.f32 1.0, %v3028_v46 }
 0x2ce   : > { %v3032_v60 = vpop.eup %3031  ;;  %v2097_v1 = vsel %vm2047_vm3, %v2096_v51, %v2092_v13  ;;  %v1537_v17 = vadd.f32 %v3980_v57, %v1428_v55  ;;  %3057 = vpow2.f32 %v2557_v37  ;;  %v2528_v9 = vmul.f32 -1.442695, %v1538_v0 }
 0x2cf   : > { %v3034_v4 = vpop.eup %3033  ;;  %v2252_v42 = vrot.slane %v3032_v60, %v4022_v7  ;;  %v2102_v5 = vsel %vm2054_vm4, %v2101_v52, %v2097_v1  ;;  %v1494_v58 = vpop.xlane.xlu0 %1493  ;;  %v1819_v31 = vadd.f32 1.0, %v3030_v38  ;;  %3059 = vpow2.f32 %v2558_v2 }
 0x2d0   : > { %v3036_v19 = vpop.eup %3035  ;;  %v1570_v28 = vadd.f32 %v3980_v57, %v1494_v58  ;;  %v2527_v29 = vmul.f32 -1.442695, %v1537_v17  ;;  %3061 = vrcp.f32 %v1820_v62  ;;  %v1790_v15 = vadd.f32 1.0, %v3034_v4 }
 0x2d1   : > { %v3038_v63 = vpop.eup %3037  ;;  %v2253_v27 = vsel %vm2047_vm3, %v2252_v42, %v2248_v25  ;;  %v1434_v30 = vpop.xlane.xlu1 %1433  ;;  %3063 = vpow2.f32 %v2528_v9  ;;  %v2111_v32 = vrot.slane %v3036_v19, %v4058_v22 }
 0x2d2   : > { %v3040_v39 = vpop.eup %3039  ;;  %v2258_v53 = vsel %vm2054_vm4, %v2257_v21, %v2253_v27  ;;  %v2560_v40 = vmul.f32 -1.442695, %v1570_v28  ;;  %v1540_v44 = vadd.f32 %v3980_v57, %v1434_v30  ;;  %3065 = vrcp.f32 %v1819_v31 }
 0x2d3   : > { %v3042_v54 = vpop.eup %3041  ;;  %v1492_v13 = vpop.xlane.xlu0 %1491  ;;  %v1822_v35 = vadd.f32 1.0, %v3038_v63  ;;  %3067 = vpow2.f32 %v2527_v29  ;;  %v2267_v20 = vrot.slane %v3040_v39, %v4058_v22 }
 0x2d4   : > { %v3044_v43 = vpop.eup %3043  ;;  %v1569_v16 = vadd.f32 %v3980_v57, %v1492_v13  ;;  %v1821_v12 = vadd.f32 1.0, %v3042_v54  ;;  %3069 = vpow2.f32 %v2560_v40  ;;  %v2530_v18 = vmul.f32 -1.442695, %v1540_v44 }
 0x2d5   : > { %v3046_v14 = vpop.eup %3045  ;;  %v2106_v59 = vrot.slane %v3044_v43, %v4035_v49  ;;  %v1498_v47 = vpop.xlane.xlu1 %1497  ;;  %3071 = vrcp.f32 %v1790_v15 }
 0x2d6   : > { %v3048_v61 = vpop.eup %3047  ;;  %v1572_v25 = vadd.f32 %v3980_v57, %v1498_v47  ;;  %v2559_v51 = vmul.f32 -1.442695, %v1569_v16  ;;  %v2121_v37 = vrot.slane %v3046_v14, %v4063_v10  ;;  %3073 = vrcp.f32 %v1822_v35 }
 0x2d7   : > { %v3050_v34 = vpop.eup %3049  ;;  %v2107_v24 = vsel %vm2061_vm5, %v2106_v59, %v2102_v5  ;;  %v2262_v33 = vrot.slane %v3048_v61, %v4035_v49  ;;  %v1432_v36 = vpop.xlane.xlu0 %1431  ;;  %3075 = vrcp.f32 %v1821_v12 }
 0x2d8   : > { %v3052_v45 = vpop.eup %3051  ;;  %v2112_v48 = vsel %vm2068_vm6, %v2111_v32, %v2107_v24  ;;  %v1539_v38 = vadd.f32 %v3980_v57, %v1432_v36  ;;  %v1789_v55 = vadd.f32 1.0, %v3050_v34  ;;  %v2562_v2 = vmul.f32 -1.442695, %v1572_v25 }
 0x2d9   : > { %v2116_v26 = vrot.slane %v3052_v45, %v4070_v56  ;;  %v1496_v41 = vpop.xlane.xlu1 %1495  ;;  %v2263_v50 = vsel %vm2061_vm5, %v2262_v33, %v2258_v53  ;;  %v3054_v46 = vpop.eup %3053  ;;  %3077 = vpow2.f32 %v2530_v18 }
 0x2da   : > { %v4133_v52 = vsel %vm2068_vm6, %v2267_v20, %v2263_v50  ;;  %v3056_v1 = vpop.eup %3055  ;;  %v1571_v4 = vadd.f32 %v3980_v57, %v1496_v41  ;;  %v1791_v42 = vadd.f32 1.0, %v3054_v46  ;;  %3079 = vpow2.f32 %v2559_v51 }
 0x2db   : > { %v2117_v0 = vsel %vm2075_vm7, %v2116_v26, %v2112_v48  ;;  %v1438_v60 = vpop.xlane.xlu0 %1437  ;;  %v3058_v58 = vpop.eup %3057  ;;  %v2529_v19 = vmul.f32 -1.442695, %v1539_v38  ;;  %3081 = vrcp.f32 %v1789_v55  ;;  %v1792_v62 = vadd.f32 1.0, %v3056_v1 }
 0x2dc   : > { %v2122_v17 = vsel %vm2082_vm8, %v2121_v37, %v2117_v0  ;;  %v1542_v21 = vadd.f32 %v3980_v57, %v1438_v60  ;;  %v3060_v9 = vpop.eup %3059  ;;  %3083 = vpow2.f32 %v2562_v2  ;;  %v2561_v28 = vmul.f32 -1.442695, %v1571_v4 }
 0x2dd   : > { %v1436_v5 = vpop.xlane.xlu1 %1435  ;;  %v4141_v27 = vsel %vm2357_vm9, %v2122_v17, %v4089_v11  ;;  %v4144_v39 = vpop.eup %3061  ;;  %3085 = vrcp.f32 %v1791_v42  ;;  %v1823_v31 = vadd.f32 1.0, %v3058_v58  ;;  %v1824_v11 = vadd.f32 1.0, %v3060_v9 }
 0x2de   : > { %v1541_v30 = vadd.f32 %v3980_v57, %v1436_v5  ;;  %v3064_v29 = vpop.eup %3063  ;;  %3087 = vpow2.f32 %v2529_v19  ;;  %v2532_v13 = vmul.f32 -1.442695, %v1542_v21 }
 0x2df   : > { %v1502_v63 = vpop.xlane.xlu0 %1501  ;;  %v4147_v43 = vpop.eup %3065  ;;  %3089 = vrcp.f32 %v1792_v62  ;;  %v1794_v47 = vadd.f32 1.0, %v3064_v29 }
 0x2e0   : > { %v3068_v59 = vpop.eup %3067  ;;  %3091 = vpow2.f32 %v2561_v28  ;;  %v2531_v40 = vmul.f32 -1.442695, %v1541_v30  ;;  %v1574_v44 = vadd.f32 %v3980_v57, %v1502_v63 }
 0x2e1   : > { %v1500_v54 = vpop.xlane.xlu1 %1499  ;;  %3093 = vrcp.f32 %v1823_v31  ;;  %v3070_v32 = vpop.eup %3069  ;;  %v1793_v24 = vadd.f32 1.0, %v3068_v59 }
 0x2e2   : > { %v1573_v53 = vadd.f32 %v3980_v57, %v1500_v54  ;;  %3095 = vpow2.f32 %v2532_v13  ;;  %v4151_v34 = vpop.eup %3071  ;;  %v2564_v45 = vmul.f32 -1.442695, %v1574_v44  ;;  %v1826_v12 = vadd.f32 1.0, %v3070_v32 }
 0x2e3   : > { %v1442_v14 = vpop.xlane.xlu0 %1441  ;;  %3097 = vrcp.f32 %v1824_v11  ;;  %v4154_v36 = vpop.eup %3073 }
 0x2e4   : > { %v2563_v15 = vmul.f32 -1.442695, %v1573_v53  ;;  %v1544_v16 = vadd.f32 %v3980_v57, %v1442_v14  ;;  %3099 = vpow2.f32 %v2531_v40  ;;  %v4157_v48 = vpop.eup %3075 }
 0x2e5   : > { %v1506_v61 = vpop.xlane.xlu1 %1505  ;;  %3101 = vrcp.f32 %v1794_v47 }
 0x2e6   : > { %v1576_v33 = vadd.f32 %v3980_v57, %v1506_v61  ;;  %v3078_v26 = vpop.eup %3077  ;;  %3103 = vpow2.f32 %v2563_v15  ;;  %v2534_v18 = vmul.f32 -1.442695, %v1544_v16 }
 0x2e7   : > { %v1440_v35 = vpop.xlane.xlu0 %1439  ;;  %v3080_v41 = vpop.eup %3079  ;;  %3105 = vrcp.f32 %v1793_v24  ;;  %v1796_v60 = vadd.f32 1.0, %v3078_v26 }
 0x2e8   : > { %v1543_v20 = vadd.f32 %v3980_v57, %v1440_v35  ;;  %v2566_v50 = vmul.f32 -1.442695, %v1576_v33  ;;  %v4160_v38 = vpop.eup %3081  ;;  %3107 = vpow2.f32 %v2564_v45  ;;  %v1825_v21 = vadd.f32 1.0, %v3080_v41 }
 0x2e9   : > { %v1446_v25 = vpop.xlane.xlu1 %1445  ;;  %v4163_v55 = vpop.eup %3083  ;;  %3109 = vrcp.f32 %v1826_v12 }
 0x2ea   : > { %v1546_v46 = vadd.f32 %v3980_v57, %v1446_v25  ;;  %v2533_v37 = vmul.f32 -1.442695, %v1543_v20  ;;  %v4165_v2 = vpop.eup %3085  ;;  %3111 = vpow2.f32 %v2534_v18 }
 0x2eb   : > { %v1504_v51 = vpop.xlane.xlu0 %1503  ;;  %v3088_v42 = vpop.eup %3087  ;;  %3113 = vpow2.f32 %v2566_v50 }
 0x2ec   : > { %v1575_v0 = vadd.f32 %v3980_v57, %v1504_v51  ;;  %v2536_v4 = vmul.f32 -1.442695, %v1546_v46  ;;  %v4168_v19 = vpop.eup %3089  ;;  %3115 = vpow2.f32 %v2533_v37  ;;  %v1795_v31 = vadd.f32 1.0, %v3088_v42 }
 0x2ed   : > { %v1444_v1 = vpop.xlane.xlu1 %1443  ;;  %v4171_v63 = vpop.eup %3091  ;;  %3117 = vrcp.f32 %v1796_v60 }
 0x2ee   : > { %v2565_v5 = vmul.f32 -1.442695, %v1575_v0  ;;  %v1545_v17 = vadd.f32 %v3980_v57, %v1444_v1  ;;  %v4173_v30 = vpop.eup %3093  ;;  %3119 = vpow2.f32 %v2536_v4 }
 0x2ef   : > { %v1510_v58 = vpop.xlane.xlu0 %1509  ;;  %v3096_v29 = vpop.eup %3095 }
 0x2f0   : > { %v1578_v62 = vadd.f32 %v3980_v57, %v1510_v58  ;;  %v2535_v9 = vmul.f32 -1.442695, %v1545_v17  ;;  %3121 = vpow2.f32 %v2565_v5  ;;  %v4176_v11 = vpop.eup %3097  ;;  %v1798_v61 = vadd.f32 1.0, %v3096_v29 }
 0x2f1   : > { %v1508_v28 = vpop.xlane.xlu1 %1507  ;;  %3123 = vrcp.f32 %v1825_v21  ;;  %v3100_v40 = vpop.eup %3099 }
 0x2f2   : > { %v1577_v54 = vadd.f32 %v3980_v57, %v1508_v28  ;;  %v2568_v13 = vmul.f32 -1.442695, %v1578_v62  ;;  %3125 = vpow2.f32 %v2535_v9  ;;  %v4179_v47 = vpop.eup %3101  ;;  %v1797_v35 = vadd.f32 1.0, %v3100_v40 }
 0x2f3   : > { %v1448_v53 = vpop.xlane.xlu0 %1447  ;;  %3127 = vrcp.f32 %v1795_v31  ;;  %v3104_v15 = vpop.eup %3103  ;;  %v1827_v31 = vadd.f32 1.0, %v4171_v63  ;;  %v2130_v63 = vrot.slane %v4151_v34, %v4009_v3 }
 0x2f4   : > { %v2567_v14 = vmul.f32 -1.442695, %v1577_v54  ;;  %v1547_v59 = vadd.f32 %v3980_v57, %v1448_v53  ;;  %3129 = vpow2.f32 %v2568_v13  ;;  %v4182_v33 = vpop.eup %3105  ;;  %v1829_v18 = vadd.f32 1.0, %v3104_v15 }
 0x2f5   : > { %v1450_v44 = vpop.xlane.xlu1 %1449  ;;  %v3108_v20 = vpop.eup %3107  ;;  %v1828_v15 = vadd.f32 1.0, %v4163_v55  ;;  %v2286_v55 = vrot.slane %v4154_v36, %v4009_v3 }
 0x2f6   : > { %v2537_v32 = vmul.f32 -1.442695, %v1547_v59  ;;  %v1548_v16 = vadd.f32 %v3980_v57, %v1450_v44  ;;  %3131 = vpow2.f32 %v2567_v14  ;;  %v4185_v26 = vpop.eup %3109  ;;  %v1830_v60 = vadd.f32 1.0, %v3108_v20 }
 0x2f7   : > { %v1512_v24 = vpop.xlane.xlu0 %1511  ;;  %v3112_v46 = vpop.eup %3111  ;;  %v2126_v14 = vrot.slane %v4160_v38, %v4005_v8 }
 0x2f8   : > { %v1579_v45 = vadd.f32 %v3980_v57, %v1512_v24  ;;  %3133 = vpow2.f32 %v2537_v32  ;;  %v2538_v12 = vmul.f32 -1.442695, %v1548_v16  ;;  %v3114_v51 = vpop.eup %3113  ;;  %v1800_v4 = vadd.f32 1.0, %v3112_v46 }
 0x2f9   : > { %v1514_v25 = vpop.xlane.xlu1 %1513  ;;  %3135 = vrcp.f32 %v1798_v61  ;;  %v3116_v0 = vpop.eup %3115  ;;  %v1832_v58 = vadd.f32 1.0, %v3114_v51  ;;  %v2135_v24 = vrot.slane %v4165_v2, %v4022_v7  ;;  %v2145_v46 = vrot.slane %v4182_v33, %v4035_v49 }
 0x2fa   : > { %v2569_v41 = vmul.f32 -1.442695, %v1579_v45  ;;  %v1580_v50 = vadd.f32 %v3980_v57, %v1514_v25  ;;  %3137 = vpow2.f32 %v2538_v12  ;;  %v4188_v1 = vpop.eup %3117  ;;  %v1799_v42 = vadd.f32 1.0, %v3116_v0 }
 0x2fb   : > { %3139 = vrcp.f32 %v1797_v35  ;;  %v3120_v5 = vpop.eup %3119  ;;  %v2131_v45 = vsel %vm2040_vm2, %v2130_v63, %v2126_v14  ;;  %v2282_v12 = vrot.slane %v4157_v48, %v4005_v8  ;;  %v2296_v33 = vrot.slane %v4176_v11, %v4018_v6 }
 0x2fc   : > { %v2570_v37 = vmul.f32 -1.442695, %v1580_v50  ;;  %3141 = vpow2.f32 %v2569_v41  ;;  %v1802_v9 = vadd.f32 1.0, %v3120_v5  ;;  %v2136_v50 = vsel %vm2047_vm3, %v2135_v24, %v2131_v45 }
 0x2fd   : > { %3143 = vrcp.f32 %v1829_v18  ;;  %v3122_v17 = vpop.eup %3121  ;;  %v2140_v18 = vrot.slane %v4168_v19, %v4018_v6  ;;  %v2150_v11 = vrot.slane %v4179_v47, %v4058_v22 }
 0x2fe   : > { %3145 = vpow2.f32 %v2570_v37  ;;  %v4190_v21 = vpop.eup %3123  ;;  %v1831_v57 = vadd.f32 1.0, %v3122_v17  ;;  %v2291_v37 = vrot.slane %v4173_v30, %v4022_v7 }
 0x2ff   : > { %3147 = vrcp.f32 %v1799_v42  ;;  %v3126_v62 = vpop.eup %3125  ;;  %v2141_v42 = vsel %vm2054_vm4, %v2140_v18, %v2136_v50 }
 0x300   : > { %3149 = vrcp.f32 %v1830_v60  ;;  %v4192_v28 = vpop.eup %3127  ;;  %v1801_v54 = vadd.f32 1.0, %v3126_v62  ;;  %v2287_v60 = vsel %vm2040_vm2, %v2286_v55, %v2282_v12 }
 0x301   : > { %3151 = vrcp.f32 %v1800_v4  ;;  %v3130_v29 = vpop.eup %3129 }
 0x302   : > { %3153 = vrcp.f32 %v1831_v57  ;;  %v1834_v59 = vadd.f32 1.0, %v3130_v29  ;;  %v2155_v57 = vrot.slane %v4192_v28, %v4070_v56 }
 0x303   : > { %3155 = vrcp.f32 %v1832_v58  ;;  %v3132_v13 = vpop.eup %3131  ;;  %v2146_v58 = vsel %vm2061_vm5, %v2145_v46, %v2141_v42 }
 0x304   : > { %3157 = vrcp.f32 %v1801_v54  ;;  %v1833_v40 = vadd.f32 1.0, %v3132_v13  ;;  %v2292_v54 = vsel %vm2047_vm3, %v2291_v37, %v2287_v60 }
 0x305   : > { %v3134_v53 = vpop.eup %3133  ;;  %3159 = vrcp.f32 %v1802_v9 }
 0x306   : > { %v3136_v44 = vpop.eup %3135  ;;  %3161 = vrcp.f32 %v1827_v31  ;;  %v1803_v61 = vadd.f32 1.0, %v3134_v53  ;;  %v2301_v53 = vrot.slane %v4190_v21, %v4035_v49  ;;  %v2297_v21 = vsel %vm2054_vm4, %v2296_v33, %v2292_v54 }
 0x307   : > { %v3138_v32 = vpop.eup %3137  ;;  %3163 = vrcp.f32 %v1833_v40  ;;  %v2169_v36 = vrot.slane %v3136_v44, %v4009_v3 }
 0x308   : > { %v3140_v16 = vpop.eup %3139  ;;  %3165 = vrcp.f32 %v1803_v61  ;;  %v1804_v35 = vadd.f32 1.0, %v3138_v32 }
 0x309   : > { %v3142_v38 = vpop.eup %3141  ;;  %3167 = vrcp.f32 %v1834_v59  ;;  %v2165_v2 = vrot.slane %v3140_v16, %v4005_v8  ;;  %v2151_v59 = vsel %vm2068_vm6, %v2150_v11, %v2146_v58 }
 0x30a   : > { %v3144_v20 = vpop.eup %3143  ;;  %3169 = vrcp.f32 %v1804_v35  ;;  %v1835_v25 = vadd.f32 1.0, %v3142_v38  ;;  %v2156_v44 = vsel %vm2075_vm7, %v2155_v57, %v2151_v59 }
 0x30b   : > { %v3146_v34 = vpop.eup %3145  ;;  %3171 = vrcp.f32 %v1828_v15  ;;  %v2170_v5 = vsel %vm2040_vm2, %v2169_v36, %v2165_v2  ;;  %v2321_v17 = vrot.slane %v3144_v20, %v4005_v8  ;;  %v2160_v15 = vrot.slane %v4188_v1, %v4063_v10 }
 0x30c   : > { %v3148_v41 = vpop.eup %3147  ;;  %3173 = vrcp.f32 %v1835_v25  ;;  %v1836_v48 = vadd.f32 1.0, %v3146_v34  ;;  %v2302_v20 = vsel %vm2061_vm5, %v2301_v53, %v2297_v21  ;;  %v2306_v25 = vrot.slane %v4185_v26, %v4058_v22 }
 0x30d   : > { %v3150_v51 = vpop.eup %3149  ;;  %v2174_v0 = vrot.slane %v3148_v41, %v4022_v7  ;;  %v2161_v1 = vsel %vm2082_vm8, %v2160_v15, %v2156_v44  ;;  %v2277_v26 = vrot.slane %v4144_v39, %v4063_v10 }
 0x30e   : > { %v3152_v19 = vpop.eup %3151  ;;  %3175 = vrcp.f32 %v1836_v48  ;;  %v2325_v29 = vrot.slane %v3150_v51, %v4009_v3  ;;  %v2307_v48 = vsel %vm2068_vm6, %v2306_v25, %v2302_v20 }
 0x30f   : > { %v3154_v4 = vpop.eup %3153  ;;  %v2175_v62 = vsel %vm2047_vm3, %v2174_v0, %v2170_v5  ;;  %v2179_v8 = vrot.slane %v3152_v19, %v4018_v6  ;;  %v2360_v0 = vsel %vm2359_vm10, %v2161_v1, %v4141_v27 }
 0x310   : > { %v3156_v30 = vpop.eup %3155  ;;  %v2330_v9 = vrot.slane %v3154_v4, %v4022_v7  ;;  %v2272_v7 = vrot.slane %v4147_v43, %v4070_v56  ;;  %v2326_v47 = vsel %vm2040_vm2, %v2325_v29, %v2321_v17 }
 0x311   : > { %v3158_v31 = vpop.eup %3157  ;;  %v2180_v3 = vsel %vm2054_vm4, %v2179_v8, %v2175_v62  ;;  %v2335_v43 = vrot.slane %v3156_v30, %v4018_v6 }
 0x312   : > { %v3160_v13 = vpop.eup %3159  ;;  %v2184_v28 = vrot.slane %v3158_v31, %v4035_v49  ;;  %v2331_v32 = vsel %vm2047_vm3, %v2330_v9, %v2326_v47  ;;  %v2273_v46 = vsel %vm2075_vm7, %v2272_v7, %v4133_v52 }
 0x313   : > { %v3162_v14 = vpop.eup %3161  ;;  %v2189_v16 = vrot.slane %v3160_v13, %v4058_v22  ;;  %v2336_v34 = vsel %vm2054_vm4, %v2335_v43, %v2331_v32  ;;  %v2278_v52 = vsel %vm2082_vm8, %v2277_v26, %v2273_v46 }
 0x314   : > { %v3164_v40 = vpop.eup %3163  ;;  %v2185_v61 = vsel %vm2061_vm5, %v2184_v28, %v2180_v3  ;;  %v2311_v38 = vrot.slane %v3162_v14, %v4070_v56 }
 0x315   : > { %v3166_v63 = vpop.eup %3165  ;;  %v2340_v24 = vrot.slane %v3164_v40, %v4035_v49  ;;  %v2190_v6 = vsel %vm2068_vm6, %v2189_v16, %v2185_v61 }
 0x316   : > { %v3168_v35 = vpop.eup %3167  ;;  %v2194_v45 = vrot.slane %v3166_v63, %v4070_v56  ;;  %v2312_v37 = vsel %vm2075_vm7, %v2311_v38, %v2307_v48 }
 0x317   : > { %v3170_v12 = vpop.eup %3169  ;;  %v2341_v2 = vsel %vm2061_vm5, %v2340_v24, %v2336_v34  ;;  %v2345_v50 = vrot.slane %v3168_v35, %v4058_v22 }
 0x318   : > { %v3172_v55 = vpop.eup %3171  ;;  %v2199_v49 = vrot.slane %v3170_v12, %v4063_v10  ;;  %v2195_v18 = vsel %vm2075_vm7, %v2194_v45, %v2190_v6 }
 0x319   : > { %v3174_v41 = vpop.eup %3173  ;;  %v2316_v60 = vrot.slane %v3172_v55, %v4063_v10  ;;  %v2346_v39 = vsel %vm2068_vm6, %v2345_v50, %v2341_v2 }
 0x31a   : > { %v2200_v51 = vsel %vm2082_vm8, %v2199_v49, %v2195_v18  ;;  %v2350_v36 = vrot.slane %v3174_v41, %v4070_v56 }
 0x31b   : > { %v3176_v19 = vpop.eup %3175  ;;  %v2362_v22 = vsel %vm2361_vm11, %v2200_v51, %v2360_v0  ;;  %v2317_v42 = vsel %vm2082_vm8, %v2316_v60, %v2312_v37 }
 0x31c   : > { %v2351_v56 = vsel %vm2075_vm7, %v2350_v36, %v2346_v39  ;;  %v2355_v27 = vrot.slane %v3176_v19, %v4063_v10  ;;  %v2364_v4 = vsel %vm2363_vm12, %v4097_v23, %v2362_v22 }
 0x31d   : > { %v2366_v33 = vsel %vm2365_vm13, %v2278_v52, %v2364_v4 }
 0x31e   : > { %v2356_v5 = vsel %vm2082_vm8, %v2355_v27, %v2351_v56  ;;  %v2368_v17 = vsel %vm2367_vm14, %v2317_v42, %v2366_v33 }
 0x31f   : > { %v2370_v30 = vsel %vm2369_vm15, %v2356_v5, %v2368_v17 }
 0x320   : > { %2373 = vst.msk [vmem:[%s337_s11] sm:$0xff] %vm2372_vm0, %v2370_v30 }
 0x321   : > { %3270 = shalt.err (!%p3267_p5)
}
 0x322   : > { %s3271_s12 = scalar_lea.hbm %s4290_s23, 128  ;;  %s3275_s6 = scalar_lea.hbm %s4339_s7, 256 }
 0x323   : > { %p3272_p10 = scmp.ne.s32.totalorder %s4290_s23, %s3271_s12  ;;  %p3276_p6 = scmp.lt.s32.totalorder %s4290_s23, %s4339_s7 }
 0x324   : > { %p3277_p12 = scmp.lt.s32.totalorder %s3275_s6, %s3271_s12 }
 0x325   : > { %p3273_p1 = pnand %p3272_p10, %p3492_p7 }
 0x326   : > { %p3278_p3 = por %p3277_p12, %p3276_p6 }
 0x327   : > { %p3274_p4 = pneg %p3273_p1 }
 0x329   : > { %p3279_p8 = pnand %p3278_p3, %p3274_p4 }
 0x32b   : > { %3282 = shalt.err (!%p3279_p8)
}
 0x32c   : > { %2841 = dma.vmem_to_hbm [thread:$0]  (%p3492_p7), %s2390_s17, 128, %s4290_s23, %s2375_s19  }
 0x32d PF: > { %s2401_s16 = sand.u32 1, %s3321_s26   ;;  %p4357_p9 = scmp.ne.s32.totalorder %s4348_s13, 0 }
 0x32e   : > { %p4358_p11 = scmp.ge.s32.totalorder %s3341_s8, 2  ;;  %s2402_s11 = scalar_lea.sflag [#allocation7], %s2401_s16 }
 0x330   : > { %p2855_p2 = pnand %p4358_p11, %p4357_p9 }
 0x332   : > { %p2856_p13 = pneg %p2855_p2 }
 0x334   : > { %3316 = dma.done.wait (%p2856_p13), %s2402_s11, 128  }
 0x335   : > { %3318 = vsyncadd (%p2856_p13), %s2402_s11, 4294967168  ;;  %s25_s8 = sadd.s32 1, %s3341_s8   ;;  %s4359_s26 = smov %s3325_s27 }
 0x336   : > { %p22_p0 = scmp.ge.s32.totalorder %s25_s8, 4   ;;  %s4360_s27 = smov %s3329_s28 }
 0x337   : > { %s4361_s28 = smov %s3501_s24  ;;  %s4362_s29 = smov %s3337_s30 }
 0x338   : > { %s4363_s30 = smov %s4365_s18  ;;  %24 = sbr.rel (!%p22_p0) target bundleno = 11 (0xb), region = 106 }
 0x33d   :  { %2407 = vsyncpa [#allocation6], 1 }
 0x33e   :  { %2409 = vsyncpa [#allocation6 + $0x1], 1 }
 0x33f   :  { %2410 = vsyncpa [#allocation9], 1 }
 0x340   :  { %2411 = vsyncpa [#allocation7], 1 }
 0x341   :  { %2413 = vsyncpa [#allocation7 + $0x1], 1 }

</bundles_post_ra>
